<compile_context>
chip_gen: v5e
topology: v5e:2x2
jax: 0.10.0
libtpu: 0.0.40
codegen_flags: <defaults>
</compile_context>

<pallas_src>
import functools

import numpy as np
import jax
import jax.numpy as jnp
from jax.experimental import pallas as pl
from jax.experimental.pallas import tpu as pltpu


# ----------------------------------------------------------------------------
# Deterministic mel filter bank (numpy reimplementation of librosa.filters.mel,
# slaney mel scale + slaney norm) -- no librosa / file IO required.
# ----------------------------------------------------------------------------
def _hz_to_mel(f):
    f = np.asarray(f, dtype=np.float64)
    f_sp = 200.0 / 3
    mels = f / f_sp
    min_log_hz = 1000.0
    min_log_mel = min_log_hz / f_sp
    logstep = np.log(6.4) / 27.0
    return np.where(f >= min_log_hz,
                    min_log_mel + np.log(np.maximum(f, 1e-10) / min_log_hz) / logstep,
                    mels)


def _mel_to_hz(m):
    m = np.asarray(m, dtype=np.float64)
    f_sp = 200.0 / 3
    freqs = f_sp * m
    min_log_hz = 1000.0
    min_log_mel = min_log_hz / f_sp
    logstep = np.log(6.4) / 27.0
    return np.where(m >= min_log_mel,
                    min_log_hz * np.exp(logstep * (m - min_log_mel)),
                    freqs)


def mel_filterbank(sr, n_fft, n_mels, fmin, fmax):
    n_freq = n_fft // 2 + 1
    fftfreqs = np.linspace(0.0, sr / 2.0, n_freq)
    mel_f = _mel_to_hz(np.linspace(_hz_to_mel(fmin), _hz_to_mel(fmax), n_mels + 2))
    fdiff = np.diff(mel_f)
    ramps = mel_f[:, None] - fftfreqs[None, :]
    weights = np.zeros((n_mels, n_freq), dtype=np.float64)
    for i in range(n_mels):
        lower = -ramps[i] / fdiff[i]
        upper = ramps[i + 2] / fdiff[i + 1]
        weights[i] = np.maximum(0.0, np.minimum(lower, upper))
    enorm = 2.0 / (mel_f[2:n_mels + 2] - mel_f[:n_mels])
    weights *= enorm[:, None]
    return weights.astype(np.float32)  # (n_mels, n_freq)


# ----------------------------------------------------------------------------
# Pallas kernel: streamed matmul + power_to_db; per-tile max emitted as a tiny
# second output (per-batch top_db clamp is applied in the wrapper).
# ----------------------------------------------------------------------------
def _logmel_kernel(x_ref, w_ref, o_ref, mx_ref, *, amin, db_offset, is_log,
                   need_max, ct_total, tct):
    # x_ref : (1, TCT, Fk)    streamed rows of one batch element
    # w_ref : (Fk, M)         mel filter bank, constant index -> resident
    # o_ref : (1, TCT, M)     streamed output tile
    # mx_ref: (1, 1, 8, 128)  this tile's max, broadcast lane-dense
    x = x_ref[0]                                      # (TCT, Fk)
    w = w_ref[...]                                    # (Fk, M)
    mel = jnp.dot(x, w, preferred_element_type=jnp.float32,
                  precision=jax.lax.Precision.HIGHEST)   # (TCT, M)

    if is_log:
        scale = np.float32(10.0 / np.log(10.0))
        tile = scale * jnp.log(jnp.maximum(mel, amin)) - np.float32(db_offset)
    else:
        tile = mel

    o_ref[0] = tile.astype(o_ref.dtype)

    if need_max:
        if ct_total % tct != 0:
            # Partial last tile: rows >= CT are boundary garbage -- exclude
            # them from the max (their output rows are dropped by Pallas).
            row0 = pl.program_id(1) * tct
            rows = jax.lax.broadcasted_iota(jnp.int32, tile.shape, 0)
            tile_for_max = jnp.where(row0 + rows < ct_total, tile, -jnp.inf)
        else:
            tile_for_max = tile
        tmax = jnp.max(tile_for_max)
    else:
        tmax = np.float32(0.0)
    mx_ref[0, 0] = jnp.zeros((8, 128), jnp.float32) + tmax


def _round_up(x, m):
    return ((x + m - 1) // m) * m


def _usable_vmem_bytes():
    """Generation-aware VMEM budget: physical capacity minus 1/8 headroom."""
    try:
        cap = int(pltpu.get_tpu_info().vmem_capacity_bytes)
    except Exception:
        cap = 64 << 20  # conservative fallback (v7x-sized)
    return (cap * 7) // 8   # ~112 MiB v5e/v6e, ~56 MiB v7x


def logmel_filterbank(x, melW, *, is_log=True, ref=1.0, amin=1e-10,
                      top_db=80.0, tct=8192):
    """x: (B, C, T, F); melW: (F, M) -> (B, C, T, M) float32 (logmel in dB)."""
    B, C, T, F = x.shape
    if top_db is not None and top_db < 0:
        raise ValueError("top_db must be non-negative")
    CT = C * T

    # ---- mel filter bank: trim trailing all-zero rows to a lane-aligned K ---
    # Trimming requires a concrete melW (it is a frozen parameter); if a traced
    # melW is passed (wrapper under jit over melW) we skip trimming gracefully.
    try:
        mw_np = np.asarray(melW, dtype=np.float32)
    except Exception:
        mw_np = None
    if mw_np is not None:
        Fw, M = mw_np.shape
        assert Fw == F
        nz = np.flatnonzero(np.any(mw_np != 0.0, axis=1))
        f_needed = int(nz[-1]) + 1 if nz.size else 1
        f_aligned = _round_up(f_needed, 128)
        # Nyquist / small-F fallback: full F (lane-padded, still correct).
        Fk = f_aligned if f_aligned <= F else F
        melW_k = jnp.asarray(mw_np[:Fk, :])
    else:
        Fw, M = melW.shape
        assert Fw == F
        Fk = F
        melW_k = melW.astype(jnp.float32)

    x2 = x.reshape(B, CT, F)          # free reshape, no copy of x

    # ---- CT tiling: big streamed tiles + cdiv grid (shape independent) ------
    usable_vmem = _usable_vmem_bytes()
    x_item = jnp.dtype(x.dtype).itemsize
    TCT = max(8, (min(int(tct), _round_up(CT, 8)) // 8) * 8)

    def vmem_est(t):
        fk_pad = _round_up(Fk, 128)
        m_pad = _round_up(M, 128)
        return (2 * t * fk_pad * x_item      # double-buffered input tiles
                + 2 * t * m_pad * 4          # double-buffered output tiles
                + 2 * fk_pad * m_pad * 4     # resident melW
                + 2 * 8 * 128 * 4            # per-tile max blocks
                + (1 << 20))                 # slack

    while vmem_est(TCT) > usable_vmem and TCT > 512:
        TCT = max(512, (TCT // 2 // 8) * 8)
    num_ct = pl.cdiv(CT, TCT)
    vmem_limit = int(min(usable_vmem, max(32 << 20, 2 * vmem_est(TCT))))

    need_max = bool(is_log) and (top_db is not None)
    db_offset = float(10.0 * np.log10(np.maximum(amin, ref)))
    kernel = functools.partial(
        _logmel_kernel, amin=float(amin), db_offset=db_offset,
        is_log=bool(is_log), need_max=need_max, ct_total=CT, tct=TCT)

    out, out_max = pl.pallas_call(
        kernel,
        out_shape=(jax.ShapeDtypeStruct((B, CT, M), jnp.float32),
                   jax.ShapeDtypeStruct((B, num_ct, 8, 128), jnp.float32)),
        grid_spec=pltpu.PrefetchScalarGridSpec(
            num_scalar_prefetch=0,
            grid=(B, num_ct),
            in_specs=[
                # streamed (TCT, Fk) rows of one batch element
                pl.BlockSpec((1, TCT, Fk), lambda b, ct: (b, ct, 0)),
                # mel filter bank: constant index -> fetched once, stays in VMEM
                pl.BlockSpec((Fk, M), lambda b, ct: (0, 0)),
            ],
            out_specs=(
                # fully streamed output tile (no CT-resident block)
                pl.BlockSpec((1, TCT, M), lambda b, ct: (b, ct, 0)),
                # per-(b, ct) tile max, lane-dense (8,128) block
                pl.BlockSpec((1, 1, 8, 128), lambda b, ct: (b, ct, 0, 0)),
            ),
        ),
        compiler_params=pltpu.CompilerParams(
            dimension_semantics=("parallel", "parallel"),
            vmem_limit_bytes=vmem_limit,
        ),
    )(x2, melW_k)

    if need_max:
        # Per-batch-element max (matches the module's per-i clamp), then the
        # trivial follow-up clamp -- fuse into the downstream consumer if any.
        bmax = jnp.max(out_max, axis=(1, 2, 3))               # (B,)
        out = jnp.maximum(out, (bmax - float(top_db))[:, None, None])
    return out.reshape(B, C, T, M)


# ----------------------------------------------------------------------------
# Pure-JAX reference (mirrors the PyTorch module exactly)
# ----------------------------------------------------------------------------
def logmel_reference(x, melW, *, is_log=True, ref=1.0, amin=1e-10, top_db=80.0):
    mel = jnp.einsum("bctf,fm->bctm", x, melW,
                     precision=jax.lax.Precision.HIGHEST)
    if not is_log:
        return mel
    log_spec = 10.0 * jnp.log10(jnp.maximum(mel, amin))
    log_spec = log_spec - 10.0 * np.log10(np.maximum(amin, ref))
    if top_db is not None:
        per_batch_max = jnp.max(log_spec, axis=(1, 2, 3), keepdims=True)
        log_spec = jnp.maximum(log_spec, per_batch_max - top_db)
    return log_spec


if __name__ == "__main__":
    # Small shapes consistent with the module: F = n_fft//2 + 1
    sr, n_fft, n_mels, fmin = 32000, 256, 64, 50
    B, C, T = 2, 2, 200          # CT = 400: deliberately NOT a tile multiple
    F = n_fft // 2 + 1           # 129

    key = jax.random.PRNGKey(0)
    # power-spectrogram-like, non-negative input
    x = jax.random.normal(key, (B, C, T, F), dtype=jnp.float32) ** 2

    # Case 1: fmax < Nyquist -> trailing melW rows are zero, K trimmed to 128.
    # Small tct (128) so the run exercises multi-tile streaming, the masked
    # partial last tile (400 % 128 != 0) and the decoupled top_db clamp.
    melW1 = jnp.asarray(mel_filterbank(sr, n_fft, n_mels, fmin, 14000).T)
    out1 = jax.block_until_ready(
        logmel_filterbank(x, melW1, is_log=True, ref=1.0, amin=1e-10,
                          top_db=80.0, tct=128))
    ref1 = logmel_reference(x, melW1, ref=1.0, amin=1e-10, top_db=80.0)
    np.testing.assert_allclose(np.asarray(out1), np.asarray(ref1),
                               rtol=1e-3, atol=5e-2)

    # Case 2: fmax == Nyquist -> full K = 129 (lane-padded fallback path).
    melW2 = jnp.asarray(mel_filterbank(sr, n_fft, n_mels, fmin, sr / 2).T)
    out2 = jax.block_until_ready(
        logmel_filterbank(x, melW2, is_log=True, ref=1.0, amin=1e-10,
                          top_db=80.0, tct=256))
    ref2 = logmel_reference(x, melW2, ref=1.0, amin=1e-10, top_db=80.0)
    np.testing.assert_allclose(np.asarray(out2), np.asarray(ref2),
                               rtol=1e-3, atol=5e-2)

    print("KERNEL_OK")
</pallas_src>

<mosaic_0001>
module attributes {stable_mosaic.version = 11 : i64} {
  func.func @_logmel_kernel(%arg0: i32, %arg1: i32, %arg2: memref<1x128x128xf32, #tpu.memory_space<vmem>>, %arg3: memref<128x64xf32, #tpu.memory_space<vmem>>, %arg4: memref<1x128x64xf32, #tpu.memory_space<vmem>>, %arg5: memref<1x1x8x128xf32, #tpu.memory_space<vmem>>) attributes {dimension_semantics = [#tpu.dimension_semantics<parallel>, #tpu.dimension_semantics<parallel>], iteration_bounds = array<i64: 2, 4>, scalar_prefetch = 0 : i64, scratch_operands = 0 : i64, tpu.core_type = #tpu.core_type<tc>, window_params = [{transform_indices = @transform_0, window_bounds = array<i64: 1, 128, 128>}, {pipeline_mode = #tpu.pipeline_mode<synchronous>, transform_indices = @transform_1, window_bounds = array<i64: 128, 64>}, {transform_indices = @transform_2, window_bounds = array<i64: 1, 128, 64>}, {transform_indices = @transform_3, window_bounds = array<i64: 1, 1, 8, 128>}]} {
    %c0 = arith.constant 0 : index
    %c0_0 = arith.constant 0 : index
    %c0_1 = arith.constant 0 : index
    %0 = vector.load %arg2[%c0, %c0_0, %c0_1] : memref<1x128x128xf32, #tpu.memory_space<vmem>>, vector<1x128x128xf32>
    %1 = vector.shape_cast %0 : vector<1x128x128xf32> to vector<128x128xf32>
    %c0_2 = arith.constant 0 : index
    %c0_3 = arith.constant 0 : index
    %2 = vector.load %arg3[%c0_2, %c0_3] : memref<128x64xf32, #tpu.memory_space<vmem>>, vector<128x64xf32>
    %cst = arith.constant dense<0.000000e+00> : vector<128x64xf32>
    %3 = tpu.matmul %1, %2, %cst {dimension_numbers = #tpu.dot_dimension_numbers<[1], [0], [0], [1], [0, 0, 1, 1], [], []>, precision = #tpu.contract_precision<fp32>} : vector<128x128xf32>, vector<128x64xf32>, vector<128x64xf32> -> vector<128x64xf32>
    %cst_4 = arith.constant 1.000000e-10 : f32
    %4 = vector.broadcast %cst_4 : f32 to vector<128x64xf32>
    %5 = arith.maximumf %3, %4 : vector<128x64xf32>
    %6 = math.log %5 : vector<128x64xf32>
    %cst_5 = arith.constant 4.34294462 : f32
    %7 = vector.broadcast %cst_5 : f32 to vector<128x64xf32>
    %8 = arith.mulf %7, %6 : vector<128x64xf32>
    %cst_6 = arith.constant 0.000000e+00 : f32
    %9 = vector.broadcast %cst_6 : f32 to vector<128x64xf32>
    %10 = arith.subf %8, %9 : vector<128x64xf32>
    %c0_7 = arith.constant 0 : index
    %c0_8 = arith.constant 0 : index
    %c0_9 = arith.constant 0 : index
    %11 = vector.load %arg4[%c0_7, %c0_8, %c0_9] : memref<1x128x64xf32, #tpu.memory_space<vmem>>, vector<1x128x64xf32>
    %12 = vector.shape_cast %11 : vector<1x128x64xf32> to vector<128x64xf32>
    %13 = vector.shape_cast %10 : vector<128x64xf32> to vector<1x128x64xf32>
    tpu.vector_store %arg4[%c0_7, %c0_8, %c0_9], %13 {strides = array<i32>} : memref<1x128x64xf32, #tpu.memory_space<vmem>>, vector<1x128x64xf32>,
    %c128_i32 = arith.constant 128 : i32
    %14 = arith.muli %arg1, %c128_i32 : i32
    %15 = tpu.iota {dimensions = array<i32: 0>} : vector<128x64xi32>
    %16 = vector.broadcast %14 : i32 to vector<128x64xi32>
    %17 = arith.addi %16, %15 : vector<128x64xi32>
    %c400_i32 = arith.constant 400 : i32
    %18 = vector.broadcast %c400_i32 : i32 to vector<128x64xi32>
    %19 = arith.cmpi slt, %17, %18 : vector<128x64xi32>
    %cst_10 = arith.constant 0xFF800000 : f32
    %20 = vector.broadcast %cst_10 : f32 to vector<128x64xf32>
    %21 = arith.select %19, %10, %20 : vector<128x64xi1>, vector<128x64xf32>
    %22 = vector.shape_cast %21 : vector<128x64xf32> to vector<1x128x64xf32>
    %cst_11 = arith.constant dense<0xFF800000> : vector<1xf32>
    %23 = vector.multi_reduction <maximumf>, %22, %cst_11 [1, 2] : vector<1x128x64xf32> to vector<1xf32>
    %24 = vector.shape_cast %23 : vector<1xf32> to vector<1x1x1xf32>
    %25 = vector.extract %24[0, 0, 0] : f32 from vector<1x1x1xf32>
    %cst_12 = arith.constant 0.000000e+00 : f32
    %26 = vector.broadcast %cst_12 : f32 to vector<8x128xf32>
    %27 = vector.broadcast %25 : f32 to vector<8x128xf32>
    %28 = arith.addf %26, %27 : vector<8x128xf32>
    %c0_13 = arith.constant 0 : index
    %c0_14 = arith.constant 0 : index
    %c0_15 = arith.constant 0 : index
    %c0_16 = arith.constant 0 : index
    %29 = vector.load %arg5[%c0_13, %c0_14, %c0_15, %c0_16] : memref<1x1x8x128xf32, #tpu.memory_space<vmem>>, vector<1x1x8x128xf32>
    %30 = vector.shape_cast %29 : vector<1x1x8x128xf32> to vector<8x128xf32>
    %31 = vector.shape_cast %28 : vector<8x128xf32> to vector<1x1x8x128xf32>
    tpu.vector_store %arg5[%c0_13, %c0_14, %c0_15, %c0_16], %31 {strides = array<i32>} : memref<1x1x8x128xf32, #tpu.memory_space<vmem>>, vector<1x1x8x128xf32>,
    return
  }
  func.func @transform_0(%arg0: i32, %arg1: i32) -> (i32, i32, i32) {
    %c0_i32 = arith.constant 0 : i32
    %c0_i32_0 = arith.constant 0 : i32
    return %arg0, %arg1, %c0_i32 : i32, i32, i32
  }
  func.func @transform_1(%arg0: i32, %arg1: i32) -> (i32, i32) {
    %c0_i32 = arith.constant 0 : i32
    %c0_i32_0 = arith.constant 0 : i32
    %c0_i32_1 = arith.constant 0 : i32
    return %c0_i32, %c0_i32_0 : i32, i32
  }
  func.func @transform_2(%arg0: i32, %arg1: i32) -> (i32, i32, i32) {
    %c0_i32 = arith.constant 0 : i32
    %c0_i32_0 = arith.constant 0 : i32
    return %arg0, %arg1, %c0_i32 : i32, i32, i32
  }
  func.func @transform_3(%arg0: i32, %arg1: i32) -> (i32, i32, i32, i32) {
    %c0_i32 = arith.constant 0 : i32
    %c0_i32_0 = arith.constant 0 : i32
    %c0_i32_1 = arith.constant 0 : i32
    return %arg0, %arg1, %c0_i32, %c0_i32_0 : i32, i32, i32, i32
  }
}

</mosaic_0001>

<bundles_post_ra>
// kernel: tpu_custom_call.1
= control target key start
LH: loop header
LB: loop body
LE: loop exit
PB: predicated region body
PF: predicated region fallthrough
CT: control target
= control target key end

     0   :  { %s3417_s0 = inlined_call_operand.vmem [shape: f32[2,400,129], index: 0, kind: input, shape index: {}]   ;;  %s3418_s1 = inlined_call_operand.vmem [shape: f32[128,64], index: 1, kind: input, shape index: {}]   ;;  %s3419_s2 = inlined_call_operand.vmem [shape: f32[2,400,64], index: 2, kind: output, shape index: {0}]   ;;  %s3420_s3 = inlined_call_operand.hbm [shape: f32[2,4,8,128], index: 3, kind: output, shape index: {1}]  }
   0x1   :  { %3435 = sst [smem:[#allocation8_spill]] %s3417_s0 }
   0x2   :  { %3436 = sst [smem:[#allocation9_spill]] %s3418_s1 }
   0x3   :  { %3437 = sst [smem:[#allocation10_spill]] %s3419_s2 }
   0x4   :  { %9 = vsyncpa [#allocation5], 0 }
   0x5   :  { %11 = vsyncpa [#allocation5 + $0x1], 0  ;;  %s2372_s12 = smov 0   ;;  %s2374_s13 = smov 0  }
   0x6   :  { %s2376_s14 = smov 0   ;;  %s2378_s15 = smov 0  }
   0x7   :  { %s2380_s16 = smov 0   ;;  %s2382_s17 = smov 0  }
   0x8   :  { %s2384_s18 = smov 0   ;;  %s2386_s19 = smov 0  }
   0x9 LB: > { %s1811_s20 = sadd.s32 4294967295, %s2286_s19   ;;  %s1812_s21 = sadd.s32 4294967294, %s2286_s19   ;;  %s2286_s19 = sphi %s2386_s19, %s17_s19   ;;  %s2282_s18 = sphi %s2384_s18, %s3476_s18   ;;  %s2278_s17 = sphi %s2382_s17, %s3475_s17   ;;  %s2274_s16 = sphi %s2380_s16, %s3474_s16   ;;  %s2270_s15 = sphi %s2378_s15, %s3473_s15   ;;  %s2266_s14 = sphi %s2376_s14, %s3472_s14   ;;  %s2262_s13 = sphi %s2374_s13, %s3471_s13   ;;  %s2258_s12 = sphi %s2372_s12, %s3470_s12  }
   0xa   : > { %s26_s22 = sadd.s32 1, %s2278_s17  ;;  %s29_s23 = sadd.s32 1, %s2282_s18 }
   0xb   : > { %p27_p0 = scmp.ge.s32.totalorder %s26_s22, 4  ;;  %p45_p1 = scmp.ne.s32.totalorder %s2266_s14, %s2262_s13 }
   0xc   : > { %p46_p2 = scmp.eq.s32.totalorder %s2286_s19, 0  ;;  %p98_p5 = scmp.eq.s32.totalorder %s1811_s20, 7 }
   0xd   : > { %s3478_s22 = smov (%p27_p0, %s26_s22), 0  ;;  %s3480_s23 = smov (!%p27_p0, %s29_s23), %s2282_s18 }
   0xe   : > { %s34_s24 = ssub.s32 %s2278_s17, %s3478_s22  ;;  %p2424_p3 = por %p46_p2, %p45_p1 }
   0xf   : > { %p31_p4 = scmp.ge.s32.totalorder %s3480_s23, 2  ;;  %p131_p6 = scmp.ne.s32.totalorder %s2262_s13, %s2258_s12 }
  0x10   : > { %p132_p7 = scmp.eq.s32.totalorder %s1812_s21, 7  ;;  %p2432_p8 = por %p98_p5, %p45_p1 }
  0x11   : > { %s3482_s23 = smov (%p31_p4, %s3480_s23), 0  ;;  %s38_s30 = sadd.s32 1, %s2266_s14 }
  0x12   : > { %3439 = sst [smem:[#allocation7_spill]] %s3482_s23  ;;  %p2436_p9 = por %p132_p7, %p131_p6 }
  0x13   : > { %s33_s28 = ssub.s32 %s2282_s18, %s3482_s23  ;;  %p1814_p11 = scmp.ge.s32.totalorder %s2286_s19, 8 }
  0x14   : > { %s35_s29 = sor.u32 %s34_s24, %s33_s28 }
  0x15   : > { %p36_p10 = scmp.eq.s32.totalorder %s35_s29, 0  ;;  %151 = sbr.rel (%p1814_p11) target bundleno = 79 (0x4f), region = 20 }
  0x17   : > { %s2444_s4 = scalar_select %p36_p10, %s2266_s14, %s38_s30  }
  0x1a   : > { %154 = sbr.rel (!%p2424_p3) target bundleno = 79 (0x4f), region = 24  ;;  %s156_s5 = sand.u32 (%p2424_p3), 1, %s2266_s14  }
  0x1b   : > { %s1816_s6 = sshll.u32 (%p2424_p3), %s2278_s17, 4  ;;  %s1815_s7 = sshll.u32 (%p2424_p3), %s156_s5, 7 }
  0x1c   : > { %s160_s8 = ssub.s32 (%p2424_p3), 50, %s1816_s6  ;;  %s1856_s9 = sshll.u32 (%p2424_p3), %s2278_s17, 5 }
  0x1d   : > { %p161_p12 = scmp.lt.s32.totalorder (%p2424_p3), %s160_s8, 16  ;;  %s1893_s10 = smul.u32 (%p2424_p3), 100, %s2282_s18 }
  0x1e   : > { %s3442_s0 = sld [smem:[#allocation8_spill]] (%p2424_p3)  ;;  %s2461_s29 = scalar_lea.vmem (%p2424_p3), [#allocation2], %s1815_s7  }
  0x1f   : > { %s3484_s8 = smov (!%p161_p12, %s160_s8), 16  ;;  %s167_s11 = sadd.s32 %s1893_s10, %s1856_s9 }
  0x20   : > { %s1817_s20 = sshll.u32 %s3484_s8, 3  ;;  %s1820_s21 = sshll.u32 %s167_s11, 3 }
  0x21   : > { %p1821_p13 = scmp.eq.s32.totalorder %s1817_s20, 0 }
  0x22   : > { %s2464_s30 = sshrl.u32 (!%p1821_p13), %s3484_s8, 4 }
  0x23   : > { %172 = sbr.rel (%p1821_p13) target bundleno = 79 (0x4f), region = 28  ;;  %p1822_p0 = scmp.le.s32.totalorder (!%p1821_p13), %s2464_s30, 0 }
  0x24   : > { %s2459_s28 = scalar_lea.vmem %s3442_s0, %s1820_s21  }
  0x28   : > { %1719 = sbr.rel (%p1822_p0) target bundleno = 62 (0x3e), region = 194  ;;  %s3443_s5 = smov (!%p1822_p0), %s2461_s29 }
  0x29   : > { %s3444_s6 = smov (!%p1822_p0), %s2459_s28  ;;  %s2473_s9 = smov (!%p1822_p0), 0  }
  0x2a   : > { %s2475_s10 = smov (!%p1822_p0), 0  }
  0x2d LB: >> { %v265_v0 = vld [vmem:[%s2294_s6] sm:$0xff]  ;;  %v267_v1 = vld [vmem:[%s2294_s6 + $0x10] sm:$0xff]  ;;  %s297_s7 = sadd.s32 1, %s2298_s9  ;;  %s259_s10 = sadd.s32 1, %s2302_s10   ;;  %s2302_s10 = sphi %s2475_s10, %s259_s10   ;;  %s2298_s9 = sphi %s2473_s9, %s3447_s9   ;;  %s2294_s6 = sphi %s3444_s6, %s3446_s6   ;;  %s2290_s5 = sphi %s3443_s5, %s3445_s5  }
  0x2e   : >> { %v269_v2 = vld [vmem:[%s2294_s6 + $0x20] sm:$0xff]  ;;  %266 = vst [vmem:[%s2290_s5] sm:$0xff] %v265_v0  ;;  %v271_v3 = vld [vmem:[%s2294_s6 + $0x30] sm:$0xff]  ;;  %p298_p1 = scmp.ge.s32.totalorder %s297_s7, %s2464_s30  ;;  %p258_p2 = scmp.ge.s32.totalorder %s259_s10, %s2464_s30 }
  0x2f   : >> { %268 = vst [vmem:[%s2290_s5 + $0x8] sm:$0xff] %v267_v1  ;;  %v273_v4 = vld [vmem:[%s2294_s6 + $0x40] sm:$0xff]  ;;  %v275_v5 = vld [vmem:[%s2294_s6 + $0x50] sm:$0xff] }
  0x30   : >> { %270 = vst [vmem:[%s2290_s5 + $0x10] sm:$0xff] %v269_v2  ;;  %s3486_s7 = smov (%p298_p1, %s297_s7), 0  ;;  %v277_v6 = vld [vmem:[%s2294_s6 + $0x60] sm:$0xff]  ;;  %v279_v7 = vld [vmem:[%s2294_s6 + $0x70] sm:$0xff] }
  0x31   : >> { %272 = vst [vmem:[%s2290_s5 + $0x18] sm:$0xff] %v271_v3  ;;  %s1823_s11 = sshll.u32 %s3486_s7, 8  ;;  %s1824_s20 = sshll.u32 %s3486_s7, 7  ;;  %v281_v8 = vld [vmem:[%s2294_s6 + $0x80] sm:$0xff]  ;;  %v283_v9 = vld [vmem:[%s2294_s6 + $0x90] sm:$0xff] }
  0x32   : >> { %274 = vst [vmem:[%s2290_s5 + $0x20] sm:$0xff] %v273_v4  ;;  %s302_s21 = scalar_lea.vmem %s2459_s28, %s1823_s11   ;;  %s303_s24 = scalar_lea.vmem %s2461_s29, %s1824_s20 [#allocation2]   ;;  %v285_v10 = vld [vmem:[%s2294_s6 + $0xa0] sm:$0xff]  ;;  %v287_v11 = vld [vmem:[%s2294_s6 + $0xb0] sm:$0xff] }
  0x33   : >> { %276 = vst [vmem:[%s2290_s5 + $0x28] sm:$0xff] %v275_v5  ;;  %v289_v12 = vld [vmem:[%s2294_s6 + $0xc0] sm:$0xff]  ;;  %v291_v13 = vld [vmem:[%s2294_s6 + $0xd0] sm:$0xff]  ;;  %s3447_s9 = smov %s3486_s7 }
  0x34   : >> { %278 = vst [vmem:[%s2290_s5 + $0x30] sm:$0xff] %v277_v6  ;;  %v293_v14 = vld [vmem:[%s2294_s6 + $0xe0] sm:$0xff]  ;;  %v295_v15 = vld [vmem:[%s2294_s6 + $0xf0] sm:$0xff]  ;;  %s3446_s6 = smov %s302_s21 }
  0x35   : >> { %280 = vst [vmem:[%s2290_s5 + $0x38] sm:$0xff] %v279_v7 }
  0x36   : >> { %282 = vst [vmem:[%s2290_s5 + $0x40] sm:$0xff] %v281_v8 }
  0x37   : >> { %284 = vst [vmem:[%s2290_s5 + $0x48] sm:$0xff] %v283_v9 }
  0x38   : >> { %286 = vst [vmem:[%s2290_s5 + $0x50] sm:$0xff] %v285_v10 }
  0x39   : >> { %288 = vst [vmem:[%s2290_s5 + $0x58] sm:$0xff] %v287_v11  ;;  %261 = sbr.rel (!%p258_p2) target bundleno = 45 (0x2d), region = 200 }
  0x3a   : >> { %290 = vst [vmem:[%s2290_s5 + $0x60] sm:$0xff] %v289_v12 }
  0x3b   : >> { %292 = vst [vmem:[%s2290_s5 + $0x68] sm:$0xff] %v291_v13 }
  0x3c   : >> { %294 = vst [vmem:[%s2290_s5 + $0x70] sm:$0xff] %v293_v14 }
  0x3d   : >> { %296 = vst [vmem:[%s2290_s5 + $0x78] sm:$0xff] %v295_v15  ;;  %s3445_s5 = smov %s303_s24 }
  0x3e PF: > { %s2538_s25 = sand.u32 15, %s3484_s8   ;;  %s1857_s11 = sshll.u32 %s2464_s30, 8 }
  0x3f   : > { %s2542_s20 = scalar_lea.vmem %s2459_s28, %s1857_s11   ;;  %s1858_s0 = sshll.u32 %s2464_s30, 7 }
  0x40   : > { %s310_s24 = scalar_lea.vmem %s2461_s29, %s1858_s0 [#allocation2]   ;;  %p1828_p3 = scmp.le.s32.totalorder %s2538_s25, 0 }
  0x41   : > { %s2304_s7 = smov (!%p1828_p3), %s310_s24   ;;  %s2308_s10 = smov (!%p1828_p3), %s2542_s20  }
  0x42   : > { %1733 = sbr.rel (%p1828_p3) target bundleno = 79 (0x4f), region = 205  ;;  %s2312_s21 = smov (!%p1828_p3), 0  }
  0x43   : > { %s2316_s5 = smov (!%p1828_p3), 0  }
  0x47 LB: >> { %v320_v16 = vld [vmem:[%s2310_s10] sm:$0xff]  ;;  %s322_s8 = sadd.s32 1, %s2314_s21  ;;  %s314_s5 = sadd.s32 1, %s2318_s5   ;;  %s2318_s5 = sphi %s2316_s5, %s314_s5   ;;  %s2314_s21 = sphi %s2312_s21, %s2313_s21   ;;  %s2310_s10 = sphi %s2308_s10, %s327_s10   ;;  %s2306_s7 = sphi %s2304_s7, %s328_s7  }
  0x48   : >> { %321 = vst [vmem:[%s2306_s7] sm:$0xff] %v320_v16  ;;  %p323_p4 = scmp.ge.s32.totalorder %s322_s8, %s2538_s25  ;;  %p313_p5 = scmp.ge.s32.totalorder %s314_s5, %s2538_s25 }
  0x4a   : >> { %s3488_s8 = smov (%p323_p4, %s322_s8), 0  ;;  %316 = sbr.rel (!%p313_p5) target bundleno = 71 (0x47), region = 211 }
  0x4b   : >> { %s1829_s0 = sshll.u32 %s3488_s8, 4  ;;  %s1830_s28 = sshll.u32 %s3488_s8, 3 }
  0x4c   : >> { %s327_s10 = scalar_lea.vmem %s2542_s20, %s1829_s0   ;;  %s328_s7 = scalar_lea.vmem %s310_s24, %s1830_s28 [#allocation2]  }
  0x4d   : >> { %s2313_s21 = smov %s3488_s8  }
  0x4f PF: > { %p1831_p6 = scmp.ge.s32.totalorder %s2286_s19, 1  ;;  %p333_p7 = scmp.lt.s32.totalorder %s2286_s19, 9 }
  0x51   : > { %p334_p10 = pnand %p1831_p6, %p333_p7 }
  0x52   : > { %s3448_s1 = sld [smem:[#allocation9_spill]] (!%p334_p10)  ;;  %s2590_s30 = sand.u32 (!%p334_p10), 1, %s2262_s13  }
  0x53   : > { %337 = sbr.rel (%p334_p10) target bundleno = 715 (0x2cb), region = 76  ;;  %s1832_s20 = sshll.u32 (!%p334_p10), %s2590_s30, 7 }
  0x54   : > { %s2675_s5 = scalar_lea.vmem (!%p334_p10), [#allocation2], %s1832_s20  ;;  %s1835_s24 = sshll.u32 (!%p334_p10), %s2270_s15, 7 }
  0x55   : > { %s3172_s7 = scalar_lea.vmem (!%p334_p10), [#allocation3], %s1832_s20   ;;  %s1834_s20 = sshll.u32 (!%p334_p10), %s2590_s30, 3 }
  0x56   : > { %s3273_s21 = scalar_lea.vmem (!%p334_p10), [#allocation4], %s1834_s20 }
  0x58   : > { %v408_v17 = vld [vmem:[%s3448_s1 + $0x78] sm:$0xff]  ;;  %v407_v18 = vld [vmem:[%s3448_s1 + $0x70] sm:$0xff]  ;;  %v406_v19 = vld [vmem:[%s3448_s1 + $0x68] sm:$0xff]  ;;  %vm1279_vm0 = vcmask 523264   ;;  %s1838_s8 = sshll.u32 (%p2432_p8), %s2270_s15, 4  ;;  %s1896_s0 = smul.u32 (%p2432_p8), 50, %s2274_s16 }
  0x59   : > { %v2562_v20 = vand.u32 4294901760, %v408_v17  ;;  %v2564_v21 = vand.u32 4294901760, %v407_v18  ;;  %v2566_v22 = vand.u32 4294901760, %v406_v19  ;;  %v405_v23 = vld [vmem:[%s3448_s1 + $0x60] sm:$0xff]  ;;  %v404_v24 = vld [vmem:[%s3448_s1 + $0x58] sm:$0xff]  ;;  %v403_v25 = vld [vmem:[%s3448_s1 + $0x50] sm:$0xff] }
  0x5a   : > { %v2577_v26 = vand.u32 4294901760, %v405_v23  ;;  %v2579_v27 = vand.u32 4294901760, %v404_v24  ;;  %v2581_v28 = vand.u32 4294901760, %v403_v25  ;;  %v402_v29 = vld [vmem:[%s3448_s1 + $0x48] sm:$0xff]  ;;  %v401_v30 = vld [vmem:[%s3448_s1 + $0x40] sm:$0xff]  ;;  %v400_v34 = vld [vmem:[%s3448_s1 + $0x38] sm:$0xff]  ;;  %s1425_s29 = sadd.s32 (%p2432_p8), %s1896_s0, %s1838_s8 }
  0x5b   : > { %1861 = vmatpush.msra.mxu2 %v2562_v20  ;;  %v2594_v31 = vsub.f32 %v408_v17, %v2562_v20  ;;  %v2597_v32 = vsub.f32 %v407_v18, %v2564_v21  ;;  %v2600_v33 = vsub.f32 %v406_v19, %v2566_v22  ;;  %410 = vmatpush.msra.mxu0 %v2562_v20  ;;  %v2606_v35 = vand.u32 4294901760, %v402_v29  ;;  %v399_v42 = vld [vmem:[%s3448_s1 + $0x30] sm:$0xff]  ;;  %v398_v50 = vld [vmem:[%s3448_s1 + $0x28] sm:$0xff]  ;;  %v397_v59 = vld [vmem:[%s3448_s1 + $0x20] sm:$0xff]  ;;  %s1419_s28 = ssub.s32 (%p2432_p8), 50, %s1838_s8  ;;  %s1841_s6 = sshll.u32 (%p2432_p8), %s1425_s29, 3 }
  0x5c   : > { %v2609_v36 = vsub.f32 %v405_v23, %v2577_v26  ;;  %v2612_v37 = vsub.f32 %v404_v24, %v2579_v27  ;;  %v2618_v41 = vand.u32 4294901760, %v401_v30  ;;  %v2626_v44 = vand.u32 4294901760, %v400_v34  ;;  %v385_v0 = vld [vmem:[%s2675_s5 + $0x40] sm:$0xff]  ;;  %v396_v2 = vld [vmem:[%s3448_s1 + $0x18] sm:$0xff]  ;;  %v395_v8 = vld [vmem:[%s3448_s1 + $0x10] sm:$0xff]  ;;  %p1420_p11 = scmp.lt.s32.totalorder (%p2432_p8), %s1419_s28, 16 }
  0x5d   : > { %1862 = vmatpush.msra.mxu2 %v2564_v21  ;;  %v572_v38 = vand.u32 4294901760, %v2594_v31  ;;  %v578_v39 = vand.u32 4294901760, %v2597_v32  ;;  %v584_v40 = vand.u32 4294901760, %v2600_v33  ;;  %412 = vmatpush.msra.mxu0 %v2564_v21  ;;  %v2629_v45 = vsub.f32 %v403_v25, %v2581_v28  ;;  %v394_v15 = vld [vmem:[%s3448_s1 + $0x8] sm:$0xff]  ;;  %v393_v19 = vld [vmem:[%s3448_s1] sm:$0xff]  ;;  %s3462_s2 = sld [smem:[#allocation10_spill]] (%p2432_p8) }
  0x5e   : > { %v590_v43 = vand.u32 4294901760, %v2609_v36  ;;  %v596_v49 = vand.u32 4294901760, %v2612_v37  ;;  %v2649_v52 = vand.u32 4294901760, %v399_v42  ;;  %v2652_v53 = vsub.f32 %v402_v29, %v2606_v35  ;;  %v377_v29 = vld [vmem:[%s2675_s5] sm:$0xff] }
  0x5f   : > { %1863 = vmatpush.msra.mxu2 %v2566_v22  ;;  %v573_v46 = vsub.f32 %v2594_v31, %v572_v38  ;;  %v579_v47 = vsub.f32 %v2597_v32, %v578_v39  ;;  %v585_v48 = vsub.f32 %v2600_v33, %v584_v40  ;;  %414 = vmatpush.msra.mxu0 %v2566_v22  ;;  %v3432_v56 = vand.u32 4294901760, %v2629_v45 }
  0x60   : > { %v591_v51 = vsub.f32 %v2609_v36, %v590_v43  ;;  %v2658_v57 = vsub.f32 %v401_v30, %v2618_v41  ;;  %v2660_v58 = vand.u32 4294901760, %v398_v50  ;;  %v597_v61 = vsub.f32 %v2612_v37, %v596_v49 }
  0x61   : > { %1864 = vmatpush.msra.mxu2 %v2577_v26  ;;  %v574_v54 = vand.u32 4294901760, %v573_v46  ;;  %v580_v55 = vand.u32 4294901760, %v579_v47  ;;  %416 = vmatpush.msra.mxu0 %v2577_v26  ;;  %v586_v60 = vand.u32 4294901760, %v585_v48  ;;  %v3431_v62 = vand.u32 4294901760, %v2652_v53  ;;  %v386_v47 = vld [vmem:[%s2675_s5 + $0x48] sm:$0xff] }
  0x62   : > { %v2671_v63 = vsub.f32 %v400_v34, %v2626_v44  ;;  %v3429_v1 = vand.u32 4294901760, %v2658_v57  ;;  %v592_v3 = vand.u32 4294901760, %v591_v51  ;;  %v603_v4 = vsub.f32 %v2629_v45, %v3432_v56 }
  0x63   : > { %1865 = vmatpush.msra.mxu2 %v2579_v27  ;;  %1877 = vmatpush.msra.mxu3 %v574_v54  ;;  %v2687_v5 = vand.u32 4294901760, %v397_v59  ;;  %v2690_v6 = vsub.f32 %v399_v42, %v2649_v52  ;;  %v2697_v9 = vand.u32 4294901760, %v385_v0  ;;  %v598_v10 = vand.u32 4294901760, %v597_v61  ;;  %s3286_s25 = scalar_lea.vmem (%p2432_p8), %s3462_s2, %s1841_s6  }
  0x64   : > { %575 = vmatpush.msra.mxu1 %v574_v54  ;;  %418 = vmatpush.msra.mxu0 %v2579_v27  ;;  %v3425_v7 = vand.u32 4294901760, %v2671_v63  ;;  %v609_v11 = vsub.f32 %v2652_v53, %v3431_v62  ;;  %v2703_v12 = vand.u32 4294901760, %v396_v2  ;;  %v2706_v13 = vsub.f32 %v398_v50, %v2660_v58  ;;  %v388_v62 = vld [vmem:[%s2675_s5 + $0x58] sm:$0xff] }
  0x65   : > { %1866 = vmatpush.msra.mxu2 %v2581_v28  ;;  %1878 = vmatpush.msra.mxu3 %v580_v55  ;;  %v615_v14 = vsub.f32 %v2658_v57, %v3429_v1  ;;  %v604_v16 = vand.u32 4294901760, %v603_v4  ;;  %v2716_v17 = vand.u32 4294901760, %v395_v8  ;;  %v3424_v18 = vand.u32 4294901760, %v2690_v6 }
  0x66   : > { %581 = vmatpush.msra.mxu1 %v580_v55  ;;  %420 = vmatpush.msra.mxu0 %v2581_v28  ;;  %v2723_v23 = vsub.f32 %v397_v59, %v2687_v5  ;;  %v621_v24 = vsub.f32 %v2671_v63, %v3425_v7  ;;  %v2730_v25 = vsub.f32 %v385_v0, %v2697_v9  ;;  %v610_v30 = vand.u32 4294901760, %v609_v11 }
  0x67   : > { %1867 = vmatpush.msra.mxu2 %v2606_v35  ;;  %1879 = vmatpush.msra.mxu3 %v586_v60  ;;  %v2734_v34 = vand.u32 4294901760, %v394_v15  ;;  %v3421_v42 = vand.u32 4294901760, %v2706_v13  ;;  %v2738_v46 = vsub.f32 %v396_v2, %v2703_v12  ;;  %v616_v48 = vand.u32 4294901760, %v615_v14 }
  0x68   : > { %587 = vmatpush.msra.mxu1 %v586_v60  ;;  %422 = vmatpush.msra.mxu0 %v2606_v35  ;;  %v2741_v50 = vand.u32 4294901760, %v393_v19  ;;  %v627_v51 = vsub.f32 %v2690_v6, %v3424_v18  ;;  %v3423_v54 = vand.u32 4294901760, %v2723_v23  ;;  %v2750_v55 = vsub.f32 %v395_v8, %v2716_v17 }
  0x69   : > { %1868 = vmatpush.msra.mxu2 %v2618_v41  ;;  %1880 = vmatpush.msra.mxu3 %v592_v3  ;;  %v2752_v59 = vand.u32 4294901760, %v377_v29  ;;  %v622_v60 = vand.u32 4294901760, %v621_v24  ;;  %v3422_v61 = vand.u32 4294901760, %v2730_v25  ;;  %v2756_v0 = vand.u32 4294901760, %v386_v47 }
  0x6a   : > { %593 = vmatpush.msra.mxu1 %v592_v3  ;;  %424 = vmatpush.msra.mxu0 %v2618_v41  ;;  %v633_v2 = vsub.f32 %v2706_v13, %v3421_v42  ;;  %v3426_v3 = vand.u32 4294901760, %v2738_v46  ;;  %v2764_v4 = vsub.f32 %v394_v15, %v2734_v34  ;;  %v628_v11 = vand.u32 4294901760, %v627_v51  ;;  %v387_v51 = vld [vmem:[%s2675_s5 + $0x50] sm:$0xff] }
  0x6b   : > { %1869 = vmatpush.msra.mxu2 %v2626_v44  ;;  %1881 = vmatpush.msra.mxu3 %v598_v10  ;;  %v2767_v8 = vsub.f32 %v377_v29, %v2752_v59  ;;  %v639_v14 = vsub.f32 %v2723_v23, %v3423_v54  ;;  %v2777_v15 = vsub.f32 %v393_v19, %v2741_v50  ;;  %v2801_v18 = vand.u32 4294901760, %v387_v51 }
  0x6c   : > { %599 = vmatpush.msra.mxu1 %v598_v10  ;;  %426 = vmatpush.msra.mxu0 %v2626_v44  ;;  %v378_v10 = vld [vmem:[%s2675_s5 + $0x8] sm:$0xff]  ;;  %v508_v24 = vsub.f32 %v2730_v25, %v3422_v61  ;;  %v2784_v29 = vsub.f32 %v386_v47, %v2756_v0  ;;  %v634_v19 = vand.u32 4294901760, %v633_v2  ;;  %v3430_v61 = vand.u32 4294901760, %v2764_v4 }
  0x6d   : > { %1870 = vmatpush.msra.mxu2 %v2649_v52  ;;  %1882 = vmatpush.msra.mxu3 %v604_v16  ;;  %v2788_v42 = vand.u32 4294901760, %v378_v10  ;;  %v640_v47 = vand.u32 4294901760, %v639_v14  ;;  %v662_v2 = vand.u32 4294901760, %v2777_v15  ;;  %v2822_v1 = vsub.f32 %v387_v51, %v2801_v18 }
  0x6e   : > { %605 = vmatpush.msra.mxu1 %v604_v16  ;;  %428 = vmatpush.msra.mxu0 %v2649_v52  ;;  %v3427_v16 = vand.u32 4294901760, %v2750_v55  ;;  %v509_v7 = vand.u32 4294901760, %v508_v24  ;;  %v379_v24 = vld [vmem:[%s2675_s5 + $0x10] sm:$0xff]  ;;  %v2834_v51 = vand.u32 4294901760, %v388_v62 }
  0x6f   : > { %1871 = vmatpush.msra.mxu2 %v2660_v58  ;;  %1883 = vmatpush.msra.mxu3 %v610_v30  ;;  %v2809_v14 = vsub.f32 %v378_v10, %v2788_v42  ;;  %v663_v10 = vsub.f32 %v2777_v15, %v662_v2  ;;  %v2829_v56 = vand.u32 4294901760, %v379_v24 }
  0x70   : > { %611 = vmatpush.msra.mxu1 %v610_v30  ;;  %430 = vmatpush.msra.mxu0 %v2660_v58  ;;  %v3428_v30 = vand.u32 4294901760, %v2767_v8  ;;  %v651_v54 = vsub.f32 %v2750_v55, %v3427_v16 }
  0x71   : > { %1872 = vmatpush.msra.mxu2 %v2687_v5  ;;  %1884 = vmatpush.msra.mxu3 %v616_v48 }
  0x72   : > { %617 = vmatpush.msra.mxu1 %v616_v48  ;;  %432 = vmatpush.msra.mxu0 %v2687_v5  ;;  %v645_v48 = vsub.f32 %v2738_v46, %v3426_v3  ;;  %v3433_v3 = vand.u32 4294901760, %v2784_v29 }
  0x73   : > { %1873 = vmatpush.msra.mxu2 %v2703_v12  ;;  %1885 = vmatpush.msra.mxu3 %v622_v60 }
  0x74   : > { %623 = vmatpush.msra.mxu1 %v622_v60  ;;  %434 = vmatpush.msra.mxu0 %v2703_v12  ;;  %v444_v60 = vsub.f32 %v2767_v8, %v3428_v30  ;;  %v646_v16 = vand.u32 4294901760, %v645_v48  ;;  %v652_v30 = vand.u32 4294901760, %v651_v54  ;;  %v516_v48 = vsub.f32 %v2784_v29, %v3433_v3 }
  0x75   : > { %1874 = vmatpush.msra.mxu2 %v2716_v17  ;;  %1886 = vmatpush.msra.mxu3 %v628_v11 }
  0x76   : > { %629 = vmatpush.msra.mxu1 %v628_v11  ;;  %436 = vmatpush.msra.mxu0 %v2716_v17  ;;  %v657_v11 = vsub.f32 %v2764_v4, %v3430_v61  ;;  %v451_v61 = vand.u32 4294901760, %v2809_v14 }
  0x77   : > { %1875 = vmatpush.msra.mxu2 %v2734_v34  ;;  %1887 = vmatpush.msra.mxu3 %v634_v19 }
  0x78   : > { %635 = vmatpush.msra.mxu1 %v634_v19  ;;  %438 = vmatpush.msra.mxu0 %v2734_v34  ;;  %v445_v19 = vand.u32 4294901760, %v444_v60  ;;  %v658_v54 = vand.u32 4294901760, %v657_v11  ;;  %v523_v60 = vand.u32 4294901760, %v2822_v1  ;;  %v452_v11 = vsub.f32 %v2809_v14, %v451_v61 }
  0x79   : > { %1876 = vmatpush.msra.mxu2 %v2741_v50  ;;  %1888 = vmatpush.msra.mxu3 %v640_v47 }
  0x7a   : > { %510 = vmatmul.f32.vlgmr.msra.gmra.mxu2 %v509_v7  ;;  %641 = vmatpush.msra.mxu1 %v640_v47  ;;  %v664_v7 = vand.u32 4294901760, %v663_v10  ;;  %v517_v47 = vand.u32 4294901760, %v516_v48  ;;  %v380_v10 = vld [vmem:[%s2675_s5 + $0x18] sm:$0xff]  ;;  %v453_v48 = vand.u32 4294901760, %v452_v11 }
  0x7b   : > { %1889 = vmatpush.msra.mxu3 %v646_v16  ;;  %733 = vmatpush.msrb.mxu2 %v2594_v31  ;;  %v2857_v3 = vand.u32 4294901760, %v380_v10 }
  0x7c   : > { %647 = vmatpush.msra.mxu1 %v646_v16  ;;  %440 = vmatpush.msra.mxu0 %v2741_v50  ;;  %v2841_v16 = vsub.f32 %v379_v24, %v2829_v56  ;;  %v524_v24 = vsub.f32 %v2822_v1, %v523_v60 }
  0x7d   : > { %1890 = vmatpush.msra.mxu3 %v652_v30  ;;  %736 = vmatpush.msrb.mxu2 %v2597_v32 }
  0x7e   : > { %653 = vmatpush.msra.mxu1 %v652_v30  ;;  %446 = vmatmul.f32.vlgmr.msra.gmra.mxu0 %v445_v19  ;;  %v2849_v30 = vsub.f32 %v388_v62, %v2834_v51  ;;  %v459_v19 = vand.u32 4294901760, %v2841_v16 }
  0x7f   : > { %1891 = vmatpush.msra.mxu3 %v658_v54  ;;  %739 = vmatpush.msrb.mxu2 %v2600_v33 }
  0x80   : > { %659 = vmatpush.msra.mxu1 %v658_v54  ;;  %992 = vmatpush.msrb.mxu0 %v572_v38  ;;  %v389_v54 = vld [vmem:[%s2675_s5 + $0x60] sm:$0xff]  ;;  %v525_v38 = vand.u32 4294901760, %v524_v24  ;;  %v531_v62 = vand.u32 4294901760, %v2849_v30 }
  0x81   : > { %1892 = vmatpush.msra.mxu3 %v664_v7  ;;  %742 = vmatpush.msrb.mxu2 %v2609_v36  ;;  %v2865_v31 = vand.u32 4294901760, %v389_v54 }
  0x82   : > { %518 = vmatmul.f32.gmra.mxu2 %v517_v47  ;;  %699 = vmatmul.f32.vlgmr.msra.gmra.mxu3 %v2697_v9  ;;  %v2873_v47 = vsub.f32 %v380_v10, %v2857_v3 }
  0x83   : > { %861 = vmatpush.msrb.mxu3 %v2562_v20  ;;  %665 = vmatpush.msra.mxu1 %v664_v7  ;;  %v460_v7 = vsub.f32 %v2841_v16, %v459_v19  ;;  %v2884_v32 = vsub.f32 %v389_v54, %v2865_v31  ;;  %v3449_v54 = vand.u32 4294901760, %v2629_v45 }
  0x84   : > { %667 = vmatmul.f32.vlgmr.msra.gmra.mxu1 %v2752_v59  ;;  %996 = vmatpush.msrb.mxu0 %v578_v39  ;;  %v467_v33 = vand.u32 4294901760, %v2873_v47 }
  0x85   : > { %863 = vmatpush.msrb.mxu3 %v2564_v21  ;;  %1119 = vmatpush.msrb.mxu1 %v2562_v20  ;;  %v381_v20 = vld [vmem:[%s2675_s5 + $0x20] sm:$0xff]  ;;  %v461_v39 = vand.u32 4294901760, %v460_v7  ;;  %v539_v11 = vand.u32 4294901760, %v2884_v32 }
  0x86   : > { %745 = vmatpush.msrb.mxu2 %v2612_v37  ;;  %454 = vmatmul.f32.gmra.mxu0 %v453_v48  ;;  %v468_v36 = vsub.f32 %v2873_v47, %v467_v33 }
  0x87   : > { %865 = vmatpush.msrb.mxu3 %v2566_v22  ;;  %1121 = vmatpush.msrb.mxu1 %v2564_v21  ;;  %v532_v21 = vsub.f32 %v2849_v30, %v531_v62  ;;  %v540_v48 = vsub.f32 %v2884_v32, %v539_v11 }
  0x88   : > { %1000 = vmatpush.msrb.mxu0 %v584_v40  ;;  %748 = vmatpush.msrb.mxu2 %v2629_v45  ;;  %v2891_v40 = vand.u32 4294901760, %v381_v20  ;;  %v3450_v45 = vand.u32 4294901760, %v2652_v53 }
  0x89   : > { %867 = vmatpush.msrb.mxu3 %v2577_v26  ;;  %1123 = vmatpush.msrb.mxu1 %v2566_v22  ;;  %v390_v22 = vld [vmem:[%s2675_s5 + $0x68] sm:$0xff]  ;;  %v533_v10 = vand.u32 4294901760, %v532_v21  ;;  %v541_v21 = vand.u32 4294901760, %v540_v48 }
  0x8a   : > { %526 = vmatmul.f32.gmra.mxu2 %v525_v38  ;;  %703 = vmatmul.f32.gmra.mxu3 %v2756_v0  ;;  %v2909_v24 = vsub.f32 %v381_v20, %v2891_v40  ;;  %v469_v38 = vand.u32 4294901760, %v468_v36  ;;  %v3452_v36 = vand.u32 4294901760, %v2671_v63 }
  0x8b   : > { %869 = vmatpush.msrb.mxu3 %v2579_v27  ;;  %1004 = vmatpush.msrb.mxu0 %v590_v43  ;;  %v2906_v43 = vand.u32 4294901760, %v390_v22 }
  0x8c   : > { %671 = vmatmul.f32.gmra.mxu1 %v2788_v42  ;;  %751 = vmatpush.msrb.mxu2 %v2652_v53  ;;  %v3451_v53 = vand.u32 4294901760, %v2658_v57 }
  0x8d   : > { %871 = vmatpush.msrb.mxu3 %v2581_v28  ;;  %1125 = vmatpush.msrb.mxu1 %v2577_v26  ;;  %v382_v26 = vld [vmem:[%s2675_s5 + $0x28] sm:$0xff]  ;;  %v2925_v37 = vsub.f32 %v390_v22, %v2906_v43 }
  0x8e   : > { %462 = vmatmul.f32.gmra.mxu0 %v461_v39  ;;  %754 = vmatpush.msrb.mxu2 %v2658_v57  ;;  %v2929_v7 = vand.u32 4294901760, %v382_v26 }
  0x8f   : > { %873 = vmatpush.msrb.mxu3 %v2606_v35  ;;  %1008 = vmatpush.msrb.mxu0 %v596_v49  ;;  %v391_v49 = vld [vmem:[%s2675_s5 + $0x70] sm:$0xff]  ;;  %v547_v39 = vand.u32 4294901760, %v2925_v37 }
  0x90   : > { %1127 = vmatpush.msrb.mxu1 %v2579_v27  ;;  %757 = vmatpush.msrb.mxu2 %v2671_v63  ;;  %v475_v27 = vand.u32 4294901760, %v2909_v24  ;;  %v2938_v20 = vand.u32 4294901760, %v391_v49  ;;  %v2946_v22 = vsub.f32 %v382_v26, %v2929_v7  ;;  %v392_v63 = vld [vmem:[%s2675_s5 + $0x78] sm:$0xff] }
  0x91   : > { %875 = vmatpush.msrb.mxu3 %v2618_v41  ;;  %1012 = vmatpush.msrb.mxu0 %v3449_v54  ;;  %v548_v57 = vsub.f32 %v2925_v37, %v547_v39  ;;  %v3453_v54 = vand.u32 4294901760, %v2690_v6 }
  0x92   : > { %534 = vmatmul.f32.gmra.mxu2 %v533_v10  ;;  %707 = vmatmul.f32.gmra.mxu3 %v2801_v18  ;;  %v2955_v10 = vsub.f32 %v391_v49, %v2938_v20 }
  0x93   : > { %1129 = vmatpush.msrb.mxu1 %v2581_v28  ;;  %877 = vmatpush.msrb.mxu3 %v2626_v44  ;;  %v476_v28 = vsub.f32 %v2909_v24, %v475_v27  ;;  %v549_v49 = vand.u32 4294901760, %v548_v57 }
  0x94   : > { %675 = vmatmul.f32.gmra.mxu1 %v2829_v56  ;;  %1016 = vmatpush.msrb.mxu0 %v3450_v45  ;;  %v2979_v45 = vand.u32 4294901760, %v392_v63 }
  0x95   : > { %760 = vmatpush.msrb.mxu2 %v2690_v6  ;;  %1131 = vmatpush.msrb.mxu1 %v2606_v35  ;;  %v383_v35 = vld [vmem:[%s2675_s5 + $0x30] sm:$0xff]  ;;  %v477_v26 = vand.u32 4294901760, %v476_v28  ;;  %v3454_v6 = vand.u32 4294901760, %v2706_v13  ;;  %v384_v28 = vld [vmem:[%s2675_s5 + $0x38] sm:$0xff] }
  0x96   : > { %470 = vmatmul.f32.gmra.mxu0 %v469_v38  ;;  %879 = vmatpush.msrb.mxu3 %v2649_v52  ;;  %v2965_v48 = vand.u32 4294901760, %v383_v35  ;;  %v555_v38 = vand.u32 4294901760, %v2955_v10 }
  0x97   : > { %1020 = vmatpush.msrb.mxu0 %v3451_v53  ;;  %763 = vmatpush.msrb.mxu2 %v2706_v13  ;;  %v3455_v53 = vand.u32 4294901760, %v2723_v23 }
  0x98   : > { %1133 = vmatpush.msrb.mxu1 %v2618_v41  ;;  %881 = vmatpush.msrb.mxu3 %v2660_v58  ;;  %v483_v41 = vand.u32 4294901760, %v2946_v22 }
  0x99   : > { %1024 = vmatpush.msrb.mxu0 %v3452_v36  ;;  %766 = vmatpush.msrb.mxu2 %v2723_v23  ;;  %v3002_v36 = vand.u32 4294901760, %v384_v28  ;;  %v3456_v23 = vand.u32 4294901760, %v2738_v46 }
  0x9a   : > { %542 = vmatmul.f32.gmra.mxu2 %v541_v21  ;;  %711 = vmatmul.f32.gmra.mxu3 %v2834_v51  ;;  %v2983_v21 = vsub.f32 %v383_v35, %v2965_v48  ;;  %v2999_v35 = vsub.f32 %v392_v63, %v2979_v45 }
  0x9b   : > { %1135 = vmatpush.msrb.mxu1 %v2626_v44  ;;  %883 = vmatpush.msrb.mxu3 %v2687_v5  ;;  %v484_v44 = vsub.f32 %v2946_v22, %v483_v41 }
  0x9c   : > { %679 = vmatmul.f32.gmra.mxu1 %v2857_v3  ;;  %1028 = vmatpush.msrb.mxu0 %v3453_v54  ;;  %v3457_v54 = vand.u32 4294901760, %v2750_v55 }
  0x9d   : > { %769 = vmatpush.msrb.mxu2 %v2738_v46  ;;  %1137 = vmatpush.msrb.mxu1 %v2649_v52  ;;  %v556_v52 = vsub.f32 %v2955_v10, %v555_v38  ;;  %v485_v13 = vand.u32 4294901760, %v484_v44  ;;  %v3458_v46 = vand.u32 4294901760, %v2764_v4 }
  0x9e   : > { %478 = vmatmul.f32.gmra.mxu0 %v477_v26  ;;  %885 = vmatpush.msrb.mxu3 %v2703_v12  ;;  %v563_v26 = vand.u32 4294901760, %v2999_v35 }
  0x9f   : > { %1032 = vmatpush.msrb.mxu0 %v3454_v6  ;;  %772 = vmatpush.msrb.mxu2 %v2750_v55  ;;  %v557_v57 = vand.u32 4294901760, %v556_v52 }
  0xa0   : > { %1139 = vmatpush.msrb.mxu1 %v2660_v58  ;;  %887 = vmatpush.msrb.mxu3 %v2716_v17  ;;  %v491_v58 = vand.u32 4294901760, %v2983_v21 }
  0xa1   : > { %1036 = vmatpush.msrb.mxu0 %v3455_v53  ;;  %775 = vmatpush.msrb.mxu2 %v2764_v4 }
  0xa2   : > { %550 = vmatmul.f32.gmra.mxu2 %v549_v49  ;;  %715 = vmatmul.f32.gmra.mxu3 %v2865_v31  ;;  %v492_v63 = vsub.f32 %v2983_v21, %v491_v58 }
  0xa3   : > { %1141 = vmatpush.msrb.mxu1 %v2687_v5  ;;  %778 = vmatpush.msrb.mxu2 %v2777_v15  ;;  %v498_v5 = vsub.f32 %v384_v28, %v3002_v36 }
  0xa4   : > { %683 = vmatmul.f32.gmra.mxu1 %v2891_v40  ;;  %889 = vmatpush.msrb.mxu3 %v2734_v34  ;;  %v493_v49 = vand.u32 4294901760, %v492_v63 }
  0xa5   : > { %1040 = vmatpush.msrb.mxu0 %v3456_v23  ;;  %1143 = vmatpush.msrb.mxu1 %v2703_v12  ;;  %v564_v12 = vsub.f32 %v2999_v35, %v563_v26  ;;  %v499_v44 = vand.u32 4294901760, %v498_v5 }
  0xa6   : > { %486 = vmatmul.f32.gmra.mxu0 %v485_v13  ;;  %891 = vmatpush.msrb.mxu3 %v2741_v50 }
  0xa7   : > { %1044 = vmatpush.msrb.mxu0 %v3457_v54  ;;  %1145 = vmatpush.msrb.mxu1 %v2716_v17  ;;  %v565_v17 = vand.u32 4294901760, %v564_v12  ;;  %v500_v55 = vsub.f32 %v498_v5, %v499_v44 }
  0xa9   : > { %1048 = vmatpush.msrb.mxu0 %v3458_v46  ;;  %1147 = vmatpush.msrb.mxu1 %v2734_v34  ;;  %v501_v34 = vand.u32 4294901760, %v500_v55  ;;  %v1297_v55 = vlaneseq }
  0xaa   : > { %558 = vmatmul.f32.gmra.mxu2 %v557_v57  ;;  %719 = vmatmul.f32.gmra.mxu3 %v2906_v43 }
  0xab   : > { %1052 = vmatpush.msrb.mxu0 %v662_v2  ;;  %1149 = vmatpush.msrb.mxu1 %v2741_v50  ;;  %v3459_v50 = vand.u32 4294901760, %v2767_v8 }
  0xac   : > { %687 = vmatmul.f32.gmra.mxu1 %v2929_v7 }
  0xae   : > { %494 = vmatmul.f32.gmra.mxu0 %v493_v49 }
  0xb2   : > { %566 = vmatmul.f32.gmra.mxu2 %v565_v17  ;;  %723 = vmatmul.f32.gmra.mxu3 %v2938_v20 }
  0xb4   : > { %691 = vmatmul.f32.gmra.mxu1 %v2965_v48 }
  0xb6   : > { %502 = vmatmul.f32.gmra.mxu0 %v501_v34 }
  0xba   : > { %727 = vmatmul.f32.gmra.mxu3 %v2979_v45  ;;  %781 = vmatmul.f32.vlgmr.msrb.gmra.mxu2 %v2767_v8 }
  0xbc   : > { %695 = vmatmul.f32.gmra.mxu1 %v3002_v36 }
  0xbe   : > { %1054 = vmatmul.f32.vlgmr.msrb.gmra.mxu0 %v2752_v59 }
  0xc2   : > { %786 = vmatmul.f32.gmra.mxu2 %v2809_v14  ;;  %895 = vmatmul.f32.vlgmr.msrb.gmra.mxu3 %v3459_v50  ;;  %v3461_v14 = vand.u32 4294901760, %v2784_v29 }
  0xc4   : > { %1151 = vmatmul.f32.vlgmr.msrb.gmra.mxu1 %v2752_v59 }
  0xc6   : > { %1058 = vmatmul.f32.gmra.mxu0 %v2788_v42 }
  0xca   : > { %791 = vmatmul.f32.gmra.mxu2 %v2841_v16  ;;  %901 = vmatmul.f32.gmra.mxu3 %v451_v61  ;;  %v3460_v61 = vand.u32 4294901760, %v2730_v25 }
  0xcc   : > { %1155 = vmatmul.f32.gmra.mxu1 %v2788_v42 }
  0xce   : > { %1062 = vmatmul.f32.gmra.mxu0 %v2829_v56 }
  0xd2   : > { %796 = vmatmul.f32.gmra.mxu2 %v2873_v47  ;;  %907 = vmatmul.f32.gmra.mxu3 %v459_v19 }
  0xd4   : > { %1159 = vmatmul.f32.gmra.mxu1 %v2829_v56 }
  0xd6   : > { %1066 = vmatmul.f32.gmra.mxu0 %v2857_v3 }
  0xda   : > { %801 = vmatmul.f32.gmra.mxu2 %v2909_v24  ;;  %913 = vmatmul.f32.gmra.mxu3 %v467_v33 }
  0xdc   : > { %1163 = vmatmul.f32.gmra.mxu1 %v2857_v3 }
  0xde   : > { %1070 = vmatmul.f32.gmra.mxu0 %v2891_v40 }
  0xe2   : > { %806 = vmatmul.f32.gmra.mxu2 %v2946_v22  ;;  %919 = vmatmul.f32.gmra.mxu3 %v475_v27 }
  0xe4   : > { %1167 = vmatmul.f32.gmra.mxu1 %v2891_v40 }
  0xe6   : > { %1074 = vmatmul.f32.gmra.mxu0 %v2929_v7 }
  0xea   : > { %811 = vmatmul.f32.gmra.mxu2 %v2983_v21  ;;  %925 = vmatmul.f32.gmra.mxu3 %v483_v41 }
  0xec   : > { %1171 = vmatmul.f32.gmra.mxu1 %v2929_v7 }
  0xee   : > { %1078 = vmatmul.f32.gmra.mxu0 %v2965_v48 }
  0xf2   : > { %816 = vmatmul.f32.gmra.mxu2 %v498_v5  ;;  %931 = vmatmul.f32.gmra.mxu3 %v491_v58 }
  0xf4   : > { %1175 = vmatmul.f32.gmra.mxu1 %v2965_v48 }
  0xf6   : > { %1082 = vmatmul.f32.gmra.mxu0 %v3002_v36 }
  0xfa   : > { %821 = vmatmul.f32.gmra.mxu2 %v2730_v25  ;;  %937 = vmatmul.f32.gmra.mxu3 %v499_v44 }
  0xfb   : > { %v3068_v56 = vpop.f32.mrf.mxu0 }
  0xfc   : > { %1179 = vmatmul.f32.gmra.mxu1 %v3002_v36 }
  0xfd   : > { %v511_v42 = vpop.f32.mrf.mxu2 }
  0xfe   : > { %1086 = vmatmul.f32.gmra.mxu0 %v2697_v9 }
 0x101   : > { %v3072_v59 = vpop.f32.mrf.mxu1 }
 0x102   : > { %826 = vmatmul.f32.gmra.mxu2 %v2784_v29  ;;  %943 = vmatmul.f32.gmra.mxu3 %v3460_v61 }
 0x103   : > { %v3077_v3 = vpop.f32.mrf.mxu0 }
 0x104   : > { %1183 = vmatmul.f32.gmra.mxu1 %v2697_v9 }
 0x105   : > { %v519_v4 = vpop.f32.mrf.mxu2  ;;  %v700_v8 = vpop.f32.mrf.mxu3 }
 0x106   : > { %v3080_v15 = vadd.f32 %v700_v8, %v511_v42  ;;  %1090 = vmatmul.f32.gmra.mxu0 %v2756_v0 }
 0x109   : > { %v3083_v2 = vpop.f32.mrf.mxu1 }
 0x10a   : > { %831 = vmatmul.f32.gmra.mxu2 %v2822_v1  ;;  %949 = vmatmul.f32.gmra.mxu3 %v3461_v14  ;;  %v3165_v14 = vstv %s1835_s24 }
 0x10b   : > { %v3088_v16 = vpop.f32.mrf.mxu0 }
 0x10c   : > { %1187 = vmatmul.f32.gmra.mxu1 %v2756_v0 }
 0x10d   : > { %v527_v25 = vpop.f32.mrf.mxu2  ;;  %v704_v19 = vpop.f32.mrf.mxu3 }
 0x10e   : > { %v3091_v9 = vadd.f32 %v704_v19, %v519_v4  ;;  %1094 = vmatmul.f32.gmra.mxu0 %v2801_v18 }
 0x111   : > { %v3094_v47 = vpop.f32.mrf.mxu1 }
 0x112   : > { %836 = vmatmul.f32.gmra.mxu2 %v2849_v30  ;;  %955 = vmatmul.f32.gmra.mxu3 %v523_v60 }
 0x113   : > { %v3099_v33 = vpop.f32.mrf.mxu0 }
 0x114   : > { %1191 = vmatmul.f32.gmra.mxu1 %v2801_v18 }
 0x115   : > { %v535_v29 = vpop.f32.mrf.mxu2  ;;  %v708_v40 = vpop.f32.mrf.mxu3 }
 0x116   : > { %v3102_v0 = vadd.f32 %v708_v40, %v527_v25  ;;  %1098 = vmatmul.f32.gmra.mxu0 %v2834_v51 }
 0x119   : > { %v3105_v24 = vpop.f32.mrf.mxu1 }
 0x11a   : > { %841 = vmatmul.f32.gmra.mxu2 %v2884_v32  ;;  %961 = vmatmul.f32.gmra.mxu3 %v531_v62 }
 0x11b   : > { %v3110_v27 = vpop.f32.mrf.mxu0 }
 0x11c   : > { %1195 = vmatmul.f32.gmra.mxu1 %v2834_v51 }
 0x11d   : > { %v543_v1 = vpop.f32.mrf.mxu2  ;;  %v712_v60 = vpop.f32.mrf.mxu3 }
 0x11e   : > { %v3113_v18 = vadd.f32 %v712_v60, %v535_v29  ;;  %1102 = vmatmul.f32.gmra.mxu0 %v2865_v31 }
 0x121   : > { %v3116_v7 = vpop.f32.mrf.mxu1 }
 0x122   : > { %846 = vmatmul.f32.gmra.mxu2 %v2925_v37  ;;  %967 = vmatmul.f32.gmra.mxu3 %v539_v11 }
 0x123   : > { %v3121_v22 = vpop.f32.mrf.mxu0 }
 0x124   : > { %1199 = vmatmul.f32.gmra.mxu1 %v2865_v31 }
 0x125   : > { %v551_v30 = vpop.f32.mrf.mxu2  ;;  %v716_v62 = vpop.f32.mrf.mxu3 }
 0x126   : > { %v3124_v51 = vadd.f32 %v716_v62, %v543_v1  ;;  %1106 = vmatmul.f32.gmra.mxu0 %v2906_v43 }
 0x129   : > { %v3127_v41 = vpop.f32.mrf.mxu1 }
 0x12a   : > { %851 = vmatmul.f32.gmra.mxu2 %v2955_v10  ;;  %973 = vmatmul.f32.gmra.mxu3 %v547_v39 }
 0x12b   : > { %v3132_v48 = vpop.f32.mrf.mxu0 }
 0x12c   : > { %1203 = vmatmul.f32.gmra.mxu1 %v2906_v43 }
 0x12d   : > { %v559_v32 = vpop.f32.mrf.mxu2  ;;  %v720_v11 = vpop.f32.mrf.mxu3 }
 0x12e   : > { %v3135_v31 = vadd.f32 %v720_v11, %v551_v30  ;;  %1110 = vmatmul.f32.gmra.mxu0 %v2938_v20  ;;  %v681_v30 = vadd.f32 %v3105_v24, %v3099_v33  ;;  %v685_v24 = vadd.f32 %v3116_v7, %v3110_v27 }
 0x131   : > { %v3138_v21 = vpop.f32.mrf.mxu1 }
 0x132   : > { %856 = vmatmul.f32.gmra.mxu2 %v2999_v35  ;;  %979 = vmatmul.f32.gmra.mxu3 %v555_v38 }
 0x133   : > { %v3143_v6 = vpop.f32.mrf.mxu0 }
 0x134   : > { %1207 = vmatmul.f32.gmra.mxu1 %v2938_v20  ;;  %v669_v20 = vadd.f32 %v3072_v59, %v3068_v56  ;;  %v677_v56 = vadd.f32 %v3094_v47, %v3088_v16 }
 0x135   : > { %v567_v37 = vpop.f32.mrf.mxu2  ;;  %v724_v39 = vpop.f32.mrf.mxu3 }
 0x136   : > { %v3146_v43 = vadd.f32 %v724_v39, %v559_v32  ;;  %1114 = vmatmul.f32.gmra.mxu0 %v2979_v45 }
 0x139   : > { %v3149_v28 = vpop.f32.mrf.mxu1 }
 0x13a   : > { %985 = vmatmul.f32.gmra.mxu3 %v563_v26  ;;  %v673_v26 = vadd.f32 %v3083_v2, %v3077_v3  ;;  %v3163_v3 = vshrl.u32 %v1297_v55, 7 }
 0x13b   : > { %v1055_v52 = vpop.f32.mrf.mxu0 }
 0x13c   : > { %1211 = vmatmul.f32.gmra.mxu1 %v2979_v45  ;;  %v1299_v29 = vadd.s32 8, %v3163_v3  ;;  %v1315_v47 = vadd.s32 %v3165_v14, %v3163_v3  ;;  %v1301_v7 = vadd.s32 24, %v3163_v3 }
 0x13d   : > { %v728_v10 = vpop.f32.mrf.mxu3  ;;  %v782_v38 = vpop.f32.mrf.mxu2 }
 0x13e   : > { %v3154_v53 = vadd.f32 %v728_v10, %v567_v37  ;;  %v783_v36 = vadd.f32 %v782_v38, %v669_v20  ;;  %v1316_v62 = vadd.s32 %v3165_v14, %v1299_v29  ;;  %vm1331_vm1 = vcmp.lt.s32.totalorder %v1315_v47, 400 }
 0x13f   : > { %v1300_v20 = vadd.s32 16, %v3163_v3 }
 0x140   : > { %vm1332_vm2 = vcmp.lt.s32.totalorder %v1316_v62, 400 }
 0x141   : > { %v1152_v13 = vpop.f32.mrf.mxu1 }
 0x143   : > { %v1059_v58 = vpop.f32.mrf.mxu0 }
 0x145   : > { %v787_v23 = vpop.f32.mrf.mxu2  ;;  %v896_v57 = vpop.f32.mrf.mxu3 }
 0x146   : > { %v897_v63 = vadd.f32 %v896_v57, %v783_v36  ;;  %v788_v46 = vadd.f32 %v787_v23, %v673_v26  ;;  %v1317_v26 = vadd.s32 %v3165_v14, %v1300_v20 }
 0x148   : > { %v1056_v5 = vadd.f32 %v1055_v52, %v897_v63  ;;  %vm1333_vm3 = vcmp.lt.s32.totalorder %v1317_v26, 400 }
 0x149   : > { %v1156_v35 = vpop.f32.mrf.mxu1 }
 0x14a   : > { %v1153_v45 = vadd.f32 %v1152_v13, %v1056_v5 }
 0x14b   : > { %v1063_v54 = vpop.f32.mrf.mxu0 }
 0x14c   : > { %v1215_v12 = vmax.f32 %v1153_v45, 1e-10 }
 0x14d   : > { %v792_v49 = vpop.f32.mrf.mxu2  ;;  %v902_v44 = vpop.f32.mrf.mxu3 }
 0x14e   : > { %2096 = vlog2.f32 %v1215_v12  ;;  %v903_v17 = vadd.f32 %v902_v44, %v788_v46  ;;  %v793_v4 = vadd.f32 %v792_v49, %v677_v56 }
 0x150   : > { %v1060_v34 = vadd.f32 %v1059_v58, %v903_v17 }
 0x151   : > { %v1160_v50 = vpop.f32.mrf.mxu1 }
 0x152   : > { %v1157_v42 = vadd.f32 %v1156_v35, %v1060_v34 }
 0x153   : > { %v1067_v59 = vpop.f32.mrf.mxu0 }
 0x154   : > { %v2097_v61 = vpop.eup %2096  ;;  %v1216_v8 = vmax.f32 %v1157_v42, 1e-10 }
 0x155   : > { %v1232_v2 = vmul.f32 0.6931472, %v2097_v61  ;;  %v797_v25 = vpop.f32.mrf.mxu2  ;;  %v908_v19 = vpop.f32.mrf.mxu3  ;;  %v689_v61 = vadd.f32 %v3127_v41, %v3121_v22 }
 0x156   : > { %2098 = vlog2.f32 %v1216_v8  ;;  %v909_v40 = vadd.f32 %v908_v19, %v793_v4  ;;  %v798_v39 = vadd.f32 %v797_v25, %v681_v30  ;;  %v1318_v8 = vadd.s32 %v3165_v14, %v1301_v7 }
 0x157   : > { %v1263_v16 = vmul.f32 4.3429446, %v1232_v2  ;;  %v1302_v30 = vadd.s32 32, %v3163_v3 }
 0x158   : > { %v1064_v1 = vadd.f32 %v1063_v54, %v909_v40  ;;  %vm1334_vm4 = vcmp.lt.s32.totalorder %v1318_v8, 400 }
 0x159   : > { %1280 = vst.msk [vmem:[%s3172_s7] sm:$0xff] %vm1279_vm0, %v1263_v16  ;;  %v1164_v60 = vpop.f32.mrf.mxu1  ;;  %v1347_v36 = vsel %vm1331_vm1, %v1263_v16, -inf }
 0x15a   : > { %v1161_v32 = vadd.f32 %v1160_v50, %v1064_v1  ;;  %v1363_v5 = vsel %vm1279_vm0, %v1347_v36, -inf }
 0x15b   : > { %v1071_v11 = vpop.f32.mrf.mxu0 }
 0x15c   : > { %v2099_v37 = vpop.eup %2098  ;;  %v1217_v52 = vmax.f32 %v1161_v32, 1e-10 }
 0x15d   : > { %v1234_v10 = vmul.f32 0.6931472, %v2099_v37  ;;  %v802_v38 = vpop.f32.mrf.mxu2  ;;  %v914_v13 = vpop.f32.mrf.mxu3  ;;  %v693_v37 = vadd.f32 %v3138_v21, %v3132_v48 }
 0x15e   : > { %2100 = vlog2.f32 %v1217_v52  ;;  %v915_v58 = vadd.f32 %v914_v13, %v798_v39  ;;  %v803_v49 = vadd.f32 %v802_v38, %v685_v24  ;;  %v1319_v52 = vadd.s32 %v3165_v14, %v1302_v30 }
 0x15f   : > { %v1264_v23 = vmul.f32 4.3429446, %v1234_v10 }
 0x160   : > { %v1068_v33 = vadd.f32 %v1067_v59, %v915_v58  ;;  %vm1335_vm5 = vcmp.lt.s32.totalorder %v1319_v52, 400 }
 0x161   : > { %1281 = vst.msk [vmem:[%s3172_s7 + $0x8] sm:$0xff] %vm1279_vm0, %v1264_v23  ;;  %v1348_v57 = vsel %vm1332_vm2, %v1264_v23, -inf  ;;  %v1168_v63 = vpop.f32.mrf.mxu1 }
 0x162   : > { %v1364_v35 = vsel %vm1279_vm0, %v1348_v57, -inf  ;;  %v1165_v45 = vadd.f32 %v1164_v60, %v1068_v33 }
 0x163   : > { %v1368_v54 = vmax.f32 %v1363_v5, %v1364_v35  ;;  %v1075_v46 = vpop.f32.mrf.mxu0  ;;  %v697_v35 = vadd.f32 %v3149_v28, %v3143_v6 }
 0x164   : > { %v2101_v12 = vpop.eup %2100  ;;  %v1218_v44 = vmax.f32 %v1165_v45, 1e-10 }
 0x165   : > { %v1236_v17 = vmul.f32 0.6931472, %v2101_v12  ;;  %v807_v55 = vpop.f32.mrf.mxu2  ;;  %v920_v27 = vpop.f32.mrf.mxu3 }
 0x166   : > { %2102 = vlog2.f32 %v1218_v44  ;;  %v921_v34 = vadd.f32 %v920_v27, %v803_v49  ;;  %v808_v40 = vadd.f32 %v807_v55, %v689_v61 }
 0x167   : > { %v1265_v50 = vmul.f32 4.3429446, %v1236_v17 }
 0x168   : > { %v1072_v56 = vadd.f32 %v1071_v11, %v921_v34 }
 0x169   : > { %1282 = vst.msk [vmem:[%s3172_s7 + $0x10] sm:$0xff] %vm1279_vm0, %v1265_v50  ;;  %v1349_v42 = vsel %vm1333_vm3, %v1265_v50, -inf  ;;  %v1172_v59 = vpop.f32.mrf.mxu1 }
 0x16a   : > { %v1365_v4 = vsel %vm1279_vm0, %v1349_v42, -inf  ;;  %v1169_v2 = vadd.f32 %v1168_v63, %v1072_v56 }
 0x16b   : > { %v1370_v25 = vmax.f32 %v1365_v4, %v1368_v54  ;;  %v1079_v19 = vpop.f32.mrf.mxu0 }
 0x16c   : > { %v2103_v29 = vpop.eup %2102  ;;  %v1219_v16 = vmax.f32 %v1169_v2, 1e-10 }
 0x16d   : > { %v1238_v47 = vmul.f32 0.6931472, %v2103_v29  ;;  %v812_v1 = vpop.f32.mrf.mxu2  ;;  %v926_v60 = vpop.f32.mrf.mxu3 }
 0x16e   : > { %2104 = vlog2.f32 %v1219_v16  ;;  %v927_v62 = vadd.f32 %v926_v60, %v808_v40  ;;  %v813_v58 = vadd.f32 %v812_v1, %v693_v37 }
 0x16f   : > { %v1266_v22 = vmul.f32 4.3429446, %v1238_v47  ;;  %v1305_v47 = vadd.s32 56, %v3163_v3 }
 0x170   : > { %v1076_v41 = vadd.f32 %v1075_v46, %v927_v62 }
 0x171   : > { %1283 = vst.msk [vmem:[%s3172_s7 + $0x18] sm:$0xff] %vm1279_vm0, %v1266_v22  ;;  %v1350_v32 = vsel %vm1334_vm4, %v1266_v22, -inf  ;;  %v1176_v11 = vpop.f32.mrf.mxu1 }
 0x172   : > { %v1366_v39 = vsel %vm1279_vm0, %v1350_v32, -inf  ;;  %v1173_v10 = vadd.f32 %v1172_v59, %v1076_v41  ;;  %v1303_v59 = vadd.s32 40, %v3163_v3  ;;  %v1322_v41 = vadd.s32 %v3165_v14, %v1305_v47 }
 0x173   : > { %v1372_v38 = vmax.f32 %v1366_v39, %v1370_v25  ;;  %v1083_v13 = vpop.f32.mrf.mxu0  ;;  %v1306_v39 = vadd.s32 64, %v3163_v3 }
 0x174   : > { %v2105_v20 = vpop.eup %2104  ;;  %v1220_v36 = vmax.f32 %v1173_v10, 1e-10  ;;  %v1320_v16 = vadd.s32 %v3165_v14, %v1303_v59  ;;  %vm1338_vm8 = vcmp.lt.s32.totalorder %v1322_v41, 400 }
 0x175   : > { %v1240_v23 = vmul.f32 0.6931472, %v2105_v20  ;;  %v817_v33 = vpop.f32.mrf.mxu2  ;;  %v932_v24 = vpop.f32.mrf.mxu3 }
 0x176   : > { %2106 = vlog2.f32 %v1220_v36  ;;  %v933_v57 = vadd.f32 %v932_v24, %v813_v58  ;;  %v818_v49 = vadd.f32 %v817_v33, %v697_v35  ;;  %vm1336_vm6 = vcmp.lt.s32.totalorder %v1320_v16, 400 }
 0x177   : > { %v1267_v63 = vmul.f32 4.3429446, %v1240_v23  ;;  %v1323_v23 = vadd.s32 %v3165_v14, %v1306_v39  ;;  %v1309_v39 = vadd.s32 88, %v3163_v3 }
 0x178   : > { %v1080_v5 = vadd.f32 %v1079_v19, %v933_v57  ;;  %v1304_v19 = vadd.s32 48, %v3163_v3 }
 0x179   : > { %1284 = vst.msk [vmem:[%s3172_s7 + $0x20] sm:$0xff] %vm1279_vm0, %v1267_v63  ;;  %v1351_v48 = vsel %vm1335_vm5, %v1267_v63, -inf  ;;  %v1180_v21 = vpop.f32.mrf.mxu1  ;;  %vm1339_vm9 = vcmp.lt.s32.totalorder %v1323_v23, 400 }
 0x17a   : > { %v1367_v26 = vsel %vm1279_vm0, %v1351_v48, -inf  ;;  %v1177_v45 = vadd.f32 %v1176_v11, %v1080_v5  ;;  %v1321_v30 = vadd.s32 %v3165_v14, %v1304_v19 }
 0x17b   : > { %v3206_v54 = vmax.f32 %v1367_v26, %v1372_v38  ;;  %v1087_v46 = vpop.f32.mrf.mxu0 }
 0x17c   : > { %v2107_v12 = vpop.eup %2106  ;;  %v1221_v44 = vmax.f32 %v1177_v45, 1e-10  ;;  %vm1337_vm7 = vcmp.lt.s32.totalorder %v1321_v30, 400 }
 0x17d   : > { %v1242_v17 = vmul.f32 0.6931472, %v2107_v12  ;;  %v822_v55 = vpop.f32.mrf.mxu2  ;;  %v938_v27 = vpop.f32.mrf.mxu3 }
 0x17e   : > { %2108 = vlog2.f32 %v1221_v44  ;;  %v939_v7 = vadd.f32 %v938_v27, %v818_v49  ;;  %v823_v61 = vadd.f32 %v822_v55, %v3080_v15  ;;  %v1307_v44 = vadd.s32 72, %v3163_v3 }
 0x17f   : > { %v1268_v34 = vmul.f32 4.3429446, %v1242_v17 }
 0x180   : > { %v1084_v50 = vadd.f32 %v1083_v13, %v939_v7 }
 0x181   : > { %1285 = vst.msk [vmem:[%s3172_s7 + $0x28] sm:$0xff] %vm1279_vm0, %v1268_v34  ;;  %v1184_v56 = vpop.f32.mrf.mxu1  ;;  %v1352_v13 = vsel %vm1336_vm6, %v1268_v34, -inf }
 0x182   : > { %v1181_v6 = vadd.f32 %v1180_v21, %v1084_v50 }
 0x183   : > { %v1091_v28 = vpop.f32.mrf.mxu0 }
 0x184   : > { %v2109_v42 = vpop.eup %2108  ;;  %v1222_v4 = vmax.f32 %v1181_v6, 1e-10 }
 0x185   : > { %v1244_v8 = vmul.f32 0.6931472, %v2109_v42  ;;  %v827_v2 = vpop.f32.mrf.mxu2  ;;  %v944_v25 = vpop.f32.mrf.mxu3 }
 0x186   : > { %2110 = vlog2.f32 %v1222_v4  ;;  %v945_v29 = vadd.f32 %v944_v25, %v823_v61  ;;  %v828_v32 = vadd.f32 %v827_v2, %v3091_v9  ;;  %v1369_v9 = vsel %vm1279_vm0, %v1352_v13, -inf }
 0x187   : > { %v1269_v40 = vmul.f32 4.3429446, %v1244_v8  ;;  %v1376_v26 = vmax.f32 %v1369_v9, %v3206_v54  ;;  %v1308_v25 = vadd.s32 80, %v3163_v3 }
 0x188   : > { %v1088_v1 = vadd.f32 %v1087_v46, %v945_v29 }
 0x189   : > { %1286 = vst.msk [vmem:[%s3172_s7 + $0x30] sm:$0xff] %vm1279_vm0, %v1269_v40  ;;  %v1188_v60 = vpop.f32.mrf.mxu1  ;;  %v1353_v36 = vsel %vm1337_vm7, %v1269_v40, -inf }
 0x18a   : > { %v1185_v15 = vadd.f32 %v1184_v56, %v1088_v1  ;;  %v1371_v5 = vsel %vm1279_vm0, %v1353_v36, -inf  ;;  %v1324_v56 = vadd.s32 %v3165_v14, %v1307_v44  ;;  %v1326_v36 = vadd.s32 %v3165_v14, %v1309_v39 }
 0x18b   : > { %v1095_v62 = vpop.f32.mrf.mxu0  ;;  %v1378_v55 = vmax.f32 %v1371_v5, %v1376_v26  ;;  %v1313_v39 = vadd.s32 120, %v3163_v3 }
 0x18c   : > { %v2111_v22 = vpop.eup %2110  ;;  %v1223_v11 = vmax.f32 %v1185_v15, 1e-10  ;;  %vm1340_vm10 = vcmp.lt.s32.totalorder %v1324_v56, 400  ;;  %vm1342_vm12 = vcmp.lt.s32.totalorder %v1326_v36, 400 }
 0x18d   : > { %v1246_v37 = vmul.f32 0.6931472, %v2111_v22  ;;  %v832_v52 = vpop.f32.mrf.mxu2  ;;  %v950_v10 = vpop.f32.mrf.mxu3 }
 0x18e   : > { %2112 = vlog2.f32 %v1223_v11  ;;  %v951_v38 = vadd.f32 %v950_v10, %v828_v32  ;;  %v833_v48 = vadd.f32 %v832_v52, %v3102_v0 }
 0x18f   : > { %v1270_v20 = vmul.f32 4.3429446, %v1246_v37 }
 0x190   : > { %v1092_v58 = vadd.f32 %v1091_v28, %v951_v38 }
 0x191   : > { %1287 = vst.msk [vmem:[%s3172_s7 + $0x38] sm:$0xff] %vm1279_vm0, %v1270_v20  ;;  %v1192_v33 = vpop.f32.mrf.mxu1  ;;  %v1354_v57 = vsel %vm1338_vm8, %v1270_v20, -inf }
 0x192   : > { %v1189_v24 = vadd.f32 %v1188_v60, %v1092_v58  ;;  %v1373_v49 = vsel %vm1279_vm0, %v1354_v57, -inf }
 0x193   : > { %v1099_v35 = vpop.f32.mrf.mxu0  ;;  %v1380_v34 = vmax.f32 %v1373_v49, %v1378_v55 }
 0x194   : > { %v2113_v63 = vpop.eup %2112  ;;  %v1224_v21 = vmax.f32 %v1189_v24, 1e-10 }
 0x195   : > { %v1248_v45 = vmul.f32 0.6931472, %v2113_v63  ;;  %v837_v46 = vpop.f32.mrf.mxu2  ;;  %v956_v12 = vpop.f32.mrf.mxu3 }
 0x196   : > { %2114 = vlog2.f32 %v1224_v21  ;;  %v957_v17 = vadd.f32 %v956_v12, %v833_v48  ;;  %v838_v59 = vadd.f32 %v837_v46, %v3113_v18  ;;  %v1325_v18 = vadd.s32 %v3165_v14, %v1308_v25 }
 0x197   : > { %v1271_v27 = vmul.f32 4.3429446, %v1248_v45  ;;  %v1310_v48 = vadd.s32 96, %v3163_v3 }
 0x198   : > { %v1096_v7 = vadd.f32 %v1095_v62, %v957_v17  ;;  %vm1341_vm11 = vcmp.lt.s32.totalorder %v1325_v18, 400 }
 0x199   : > { %1288 = vst.msk [vmem:[%s3172_s7 + $0x40] sm:$0xff] %vm1279_vm0, %v1271_v27  ;;  %v1355_v0 = vsel %vm1339_vm9, %v1271_v27, -inf  ;;  %v1196_v50 = vpop.f32.mrf.mxu1  ;;  %v1327_v49 = vadd.s32 %v3165_v14, %v1310_v48 }
 0x19a   : > { %v1375_v54 = vsel %vm1279_vm0, %v1355_v0, -inf  ;;  %v1193_v6 = vadd.f32 %v1192_v33, %v1096_v7 }
 0x19b   : > { %v1382_v28 = vmax.f32 %v1375_v54, %v1380_v34  ;;  %v1103_v40 = vpop.f32.mrf.mxu0  ;;  %vm1343_vm13 = vcmp.lt.s32.totalorder %v1327_v49, 400  ;;  %v1311_v54 = vadd.s32 104, %v3163_v3 }
 0x19c   : > { %v2115_v42 = vpop.eup %2114  ;;  %v1225_v61 = vmax.f32 %v1193_v6, 1e-10 }
 0x19d   : > { %v1250_v4 = vmul.f32 0.6931472, %v2115_v42  ;;  %v842_v8 = vpop.f32.mrf.mxu2  ;;  %v962_v2 = vpop.f32.mrf.mxu3 }
 0x19e   : > { %2116 = vlog2.f32 %v1225_v61  ;;  %v963_v19 = vadd.f32 %v962_v2, %v838_v59  ;;  %v843_v22 = vadd.f32 %v842_v8, %v3124_v51  ;;  %v1328_v61 = vadd.s32 %v3165_v14, %v1311_v54 }
 0x19f   : > { %v1272_v29 = vmul.f32 4.3429446, %v1250_v4 }
 0x1a0   : > { %v1100_v16 = vadd.f32 %v1099_v35, %v963_v19  ;;  %vm1344_vm14 = vcmp.lt.s32.totalorder %v1328_v61, 400 }
 0x1a1   : > { %1289 = vst.msk [vmem:[%s3172_s7 + $0x48] sm:$0xff] %vm1279_vm0, %v1272_v29  ;;  %v1356_v47 = vsel %vm1340_vm10, %v1272_v29, -inf  ;;  %v1200_v1 = vpop.f32.mrf.mxu1 }
 0x1a2   : > { %v1377_v60 = vsel %vm1279_vm0, %v1356_v47, -inf  ;;  %v1197_v30 = vadd.f32 %v1196_v50, %v1100_v16  ;;  %v1312_v47 = vadd.s32 112, %v3163_v3 }
 0x1a3   : > { %v1384_v15 = vmax.f32 %v1377_v60, %v1382_v28  ;;  %v1107_v20 = vpop.f32.mrf.mxu0 }
 0x1a4   : > { %v2117_v62 = vpop.eup %2116  ;;  %v1226_v41 = vmax.f32 %v1197_v30, 1e-10 }
 0x1a5   : > { %v1252_v32 = vmul.f32 0.6931472, %v2117_v62  ;;  %v847_v11 = vpop.f32.mrf.mxu2  ;;  %v968_v37 = vpop.f32.mrf.mxu3  ;;  %v1329_v62 = vadd.s32 %v3165_v14, %v1312_v47 }
 0x1a6   : > { %2118 = vlog2.f32 %v1226_v41  ;;  %v969_v52 = vadd.f32 %v968_v37, %v843_v22  ;;  %v848_v24 = vadd.f32 %v847_v11, %v3135_v31 }
 0x1a7   : > { %v1273_v10 = vmul.f32 4.3429446, %v1252_v32  ;;  %vm1345_vm15 = vcmp.lt.s32.totalorder %v1329_v62, 400 }
 0x1a8   : > { %v1104_v38 = vadd.f32 %v1103_v40, %v969_v52 }
 0x1a9   : > { %1290 = vst.msk [vmem:[%s3172_s7 + $0x50] sm:$0xff] %vm1279_vm0, %v1273_v10  ;;  %v1357_v13 = vsel %vm1341_vm11, %v1273_v10, -inf  ;;  %v1204_v33 = vpop.f32.mrf.mxu1 }
 0x1aa   : > { %v1379_v58 = vsel %vm1279_vm0, %v1357_v13, -inf  ;;  %v1201_v51 = vadd.f32 %v1200_v1, %v1104_v38  ;;  %v1330_v38 = vadd.s32 %v3165_v14, %v1313_v39 }
 0x1ab   : > { %v1386_v23 = vmax.f32 %v1379_v58, %v1384_v15  ;;  %v1111_v17 = vpop.f32.mrf.mxu0 }
 0x1ac   : > { %v2119_v9 = vpop.eup %2118  ;;  %v1227_v57 = vmax.f32 %v1201_v51, 1e-10  ;;  %vm1346_vm1 = vcmp.lt.s32.totalorder %v1330_v38, 400 }
 0x1ad   : > { %v1254_v63 = vmul.f32 0.6931472, %v2119_v9  ;;  %v974_v5 = vpop.f32.mrf.mxu3  ;;  %v852_v26 = vpop.f32.mrf.mxu2 }
 0x1ae   : > { %2120 = vlog2.f32 %v1227_v57  ;;  %v975_v21 = vadd.f32 %v974_v5, %v848_v24  ;;  %v853_v27 = vadd.f32 %v852_v26, %v3146_v43 }
 0x1af   : > { %v1274_v35 = vmul.f32 4.3429446, %v1254_v63 }
 0x1b0   : > { %v1108_v45 = vadd.f32 %v1107_v20, %v975_v21 }
 0x1b1   : > { %1291 = vst.msk [vmem:[%s3172_s7 + $0x58] sm:$0xff] %vm1279_vm0, %v1274_v35  ;;  %v1358_v46 = vsel %vm1342_vm12, %v1274_v35, -inf  ;;  %v1208_v50 = vpop.f32.mrf.mxu1 }
 0x1b2   : > { %v1381_v12 = vsel %vm1279_vm0, %v1358_v46, -inf  ;;  %v1205_v31 = vadd.f32 %v1204_v33, %v1108_v45 }
 0x1b3   : > { %v1388_v44 = vmax.f32 %v1381_v12, %v1386_v23  ;;  %v1115_v16 = vpop.f32.mrf.mxu0 }
 0x1b4   : > { %v2121_v55 = vpop.eup %2120  ;;  %v1228_v7 = vmax.f32 %v1205_v31, 1e-10 }
 0x1b5   : > { %v1256_v34 = vmul.f32 0.6931472, %v2121_v55  ;;  %v980_v0 = vpop.f32.mrf.mxu3  ;;  %v857_v59 = vpop.f32.mrf.mxu2 }
 0x1b6   : > { %2122 = vlog2.f32 %v1228_v7  ;;  %v981_v56 = vadd.f32 %v980_v0, %v853_v27  ;;  %v858_v25 = vadd.f32 %v857_v59, %v3154_v53 }
 0x1b7   : > { %v1275_v6 = vmul.f32 4.3429446, %v1256_v34 }
 0x1b8   : > { %v1112_v28 = vadd.f32 %v1111_v17, %v981_v56 }
 0x1b9   : > { %1292 = vst.msk [vmem:[%s3172_s7 + $0x60] sm:$0xff] %vm1279_vm0, %v1275_v6  ;;  %v1359_v42 = vsel %vm1343_vm13, %v1275_v6, -inf  ;;  %v1212_v18 = vpop.f32.mrf.mxu1 }
 0x1ba   : > { %v1209_v4 = vadd.f32 %v1208_v50, %v1112_v28  ;;  %v1383_v43 = vsel %vm1279_vm0, %v1359_v42, -inf }
 0x1bb   : > { %v1390_v8 = vmax.f32 %v1383_v43, %v1388_v44 }
 0x1bc   : > { %v2123_v2 = vpop.eup %2122  ;;  %v1229_v19 = vmax.f32 %v1209_v4, 1e-10 }
 0x1bd   : > { %v1258_v29 = vmul.f32 0.6931472, %v2123_v2  ;;  %v986_v40 = vpop.f32.mrf.mxu3 }
 0x1be   : > { %2124 = vlog2.f32 %v1229_v19  ;;  %v987_v1 = vadd.f32 %v986_v40, %v858_v25 }
 0x1bf   : > { %v1276_v60 = vmul.f32 4.3429446, %v1258_v29 }
 0x1c0   : > { %v1116_v30 = vadd.f32 %v1115_v16, %v987_v1 }
 0x1c1   : > { %1293 = vst.msk [vmem:[%s3172_s7 + $0x68] sm:$0xff] %vm1279_vm0, %v1276_v60  ;;  %v1360_v15 = vsel %vm1344_vm14, %v1276_v60, -inf }
 0x1c2   : > { %v1213_v22 = vadd.f32 %v1212_v18, %v1116_v30  ;;  %v1385_v53 = vsel %vm1279_vm0, %v1360_v15, -inf }
 0x1c3   : > { %v1391_v41 = vmax.f32 %v1385_v53, %v1390_v8 }
 0x1c4   : > { %v2125_v32 = vpop.eup %2124  ;;  %v1230_v11 = vmax.f32 %v1213_v22, 1e-10 }
 0x1c5   : > { %v1260_v37 = vmul.f32 0.6931472, %v2125_v32 }
 0x1c6   : > { %2126 = vlog2.f32 %v1230_v11 }
 0x1c7   : > { %v1277_v52 = vmul.f32 4.3429446, %v1260_v37 }
 0x1c9   : > { %1294 = vst.msk [vmem:[%s3172_s7 + $0x70] sm:$0xff] %vm1279_vm0, %v1277_v52  ;;  %v1361_v10 = vsel %vm1345_vm15, %v1277_v52, -inf }
 0x1ca   : > { %v1387_v13 = vsel %vm1279_vm0, %v1361_v10, -inf }
 0x1cb   : > { %v1392_v20 = vmax.f32 %v1387_v13, %v1391_v41 }
 0x1cc   : > { %v2127_v58 = vpop.eup %2126 }
 0x1cd   : > { %v1262_v36 = vmul.f32 0.6931472, %v2127_v58 }
 0x1cf   : > { %v1278_v51 = vmul.f32 4.3429446, %v1262_v36 }
 0x1d1   : > { %1295 = vst.msk [vmem:[%s3172_s7 + $0x78] sm:$0xff] %vm1279_vm0, %v1278_v51  ;;  %v1362_v23 = vsel %vm1346_vm1, %v1278_v51, -inf }
 0x1d2   : > { %v1389_v33 = vsel %vm1279_vm0, %v1362_v23, -inf }
 0x1d3   : > { %v1393_v3 = vmax.f32 %v1389_v33, %v1392_v20 }
 0x1d5   : > { %1394 = vmax.xlane.f32.xlu0 %v1393_v3 }
 0x248   : > { %v1395_v9 = vpop.xlane.xlu0 %1394 }
 0x249   : > { %v1396_v24 = vrot.slane %v1395_v9, 4 }
 0x24b   : > { %v1397_v57 = vmax.f32 %v1395_v9, %v1396_v24 }
 0x24d   : > { %v1398_v14 = vrot.slane %v1397_v57, 2 }
 0x24f   : > { %v1399_v63 = vmax.f32 %v1397_v57, %v1398_v14 }
 0x251   : > { %v1400_v5 = vrot.slane %v1399_v63, 1 }
 0x253   : > { %v1401_v48 = vmax.f32 %v1399_v63, %v1400_v5 }
 0x255   : > { %1894 = vpush %v1401_v48 }
 0x284   : > { %1417 = sbr.rel (!%p2432_p8) target bundleno = 697 (0x2b9), region = 84 }
 0x286   : > { %s1895_s10 = spop %1894 }
 0x287   : > { %v1403_v21 = vstv %s1895_s10 }
 0x288   : > { %1405 = vst [vmem:[%s3273_s21] sm:$0xff] %v1403_v21 }
 0x289   : > { %s3490_s28 = smov (!%p1420_p11, %s1419_s28), 16 }
 0x28a   : > { %s1839_s24 = sshll.u32 %s3490_s28, 3 }
 0x28b   : > { %p1842_p12 = scmp.eq.s32.totalorder %s1839_s24, 0 }
 0x28c   : > { %s3290_s20 = sshrl.u32 (!%p1842_p12), %s3490_s28, 4 }
 0x28d   : > { %1430 = sbr.rel (%p1842_p12) target bundleno = 697 (0x2b9), region = 88  ;;  %p1843_p13 = scmp.le.s32.totalorder (!%p1842_p12), %s3290_s20, 0 }
 0x292   : > { %1747 = sbr.rel (%p1843_p13) target bundleno = 680 (0x2a8), region = 216  ;;  %s3463_s10 = smov (!%p1843_p13), %s3286_s25 }
 0x293   : > { %s3464_s8 = smov (!%p1843_p13), %s3172_s7  ;;  %s3299_s0 = smov (!%p1843_p13), 0  }
 0x294   : > { %s3301_s29 = smov (!%p1843_p13), 0  }
 0x297 LB: >> { %v1523_v35 = vld [vmem:[%s2326_s8] sm:$0xff]  ;;  %v1525_v26 = vld [vmem:[%s2326_s8 + $0x8] sm:$0xff]  ;;  %v1527_v45 = vld [vmem:[%s2326_s8 + $0x10] sm:$0xff]  ;;  %s1555_s6 = sadd.s32 1, %s2330_s0  ;;  %s1517_s29 = sadd.s32 1, %s2334_s29   ;;  %s2334_s29 = sphi %s3301_s29, %s1517_s29   ;;  %s2330_s0 = sphi %s3299_s0, %s3467_s0   ;;  %s2326_s8 = sphi %s3464_s8, %s3466_s8   ;;  %s2322_s10 = sphi %s3463_s10, %s3465_s10  }
 0x298   : >> { %1524 = vst [vmem:[%s2322_s10] sm:$0xff] %v1523_v35  ;;  %v1529_v46 = vld [vmem:[%s2326_s8 + $0x18] sm:$0xff]  ;;  %p1556_p0 = scmp.ge.s32.totalorder %s1555_s6, %s3290_s20  ;;  %v1531_v12 = vld [vmem:[%s2326_s8 + $0x20] sm:$0xff]  ;;  %v1533_v49 = vld [vmem:[%s2326_s8 + $0x28] sm:$0xff]  ;;  %p1516_p1 = scmp.ge.s32.totalorder %s1517_s29, %s3290_s20 }
 0x299   : >> { %1526 = vst [vmem:[%s2322_s10 + $0x8] sm:$0xff] %v1525_v26  ;;  %v1535_v31 = vld [vmem:[%s2326_s8 + $0x30] sm:$0xff]  ;;  %v1537_v44 = vld [vmem:[%s2326_s8 + $0x38] sm:$0xff]  ;;  %v1539_v17 = vld [vmem:[%s2326_s8 + $0x40] sm:$0xff] }
 0x29a   : >> { %1528 = vst [vmem:[%s2322_s10 + $0x10] sm:$0xff] %v1527_v45  ;;  %s3492_s6 = smov (%p1556_p0, %s1555_s6), 0  ;;  %v1541_v55 = vld [vmem:[%s2326_s8 + $0x48] sm:$0xff]  ;;  %v1543_v27 = vld [vmem:[%s2326_s8 + $0x50] sm:$0xff]  ;;  %v1545_v7 = vld [vmem:[%s2326_s8 + $0x58] sm:$0xff] }
 0x29b   : >> { %1530 = vst [vmem:[%s2322_s10 + $0x18] sm:$0xff] %v1529_v46  ;;  %s1844_s9 = sshll.u32 %s3492_s6, 7  ;;  %v1547_v34 = vld [vmem:[%s2326_s8 + $0x60] sm:$0xff]  ;;  %v1549_v0 = vld [vmem:[%s2326_s8 + $0x68] sm:$0xff]  ;;  %v1551_v50 = vld [vmem:[%s2326_s8 + $0x70] sm:$0xff]  ;;  %s3467_s0 = smov %s3492_s6 }
 0x29c   : >> { %1532 = vst [vmem:[%s2322_s10 + $0x20] sm:$0xff] %v1531_v12  ;;  %s1560_s11 = scalar_lea.vmem %s3172_s7, %s1844_s9 [#allocation3]   ;;  %s1561_s24 = scalar_lea.vmem %s3286_s25, %s1844_s9   ;;  %v1553_v54 = vld [vmem:[%s2326_s8 + $0x78] sm:$0xff] }
 0x29d   : >> { %1534 = vst [vmem:[%s2322_s10 + $0x28] sm:$0xff] %v1533_v49  ;;  %s3466_s8 = smov %s1560_s11 }
 0x29e   : >> { %1536 = vst [vmem:[%s2322_s10 + $0x30] sm:$0xff] %v1535_v31 }
 0x29f   : >> { %1538 = vst [vmem:[%s2322_s10 + $0x38] sm:$0xff] %v1537_v44 }
 0x2a0   : >> { %1540 = vst [vmem:[%s2322_s10 + $0x40] sm:$0xff] %v1539_v17 }
 0x2a1   : >> { %1542 = vst [vmem:[%s2322_s10 + $0x48] sm:$0xff] %v1541_v55 }
 0x2a2   : >> { %1544 = vst [vmem:[%s2322_s10 + $0x50] sm:$0xff] %v1543_v27 }
 0x2a3   : >> { %1546 = vst [vmem:[%s2322_s10 + $0x58] sm:$0xff] %v1545_v7  ;;  %1519 = sbr.rel (!%p1516_p1) target bundleno = 663 (0x297), region = 222 }
 0x2a4   : >> { %1548 = vst [vmem:[%s2322_s10 + $0x60] sm:$0xff] %v1547_v34 }
 0x2a5   : >> { %1550 = vst [vmem:[%s2322_s10 + $0x68] sm:$0xff] %v1549_v0 }
 0x2a6   : >> { %1552 = vst [vmem:[%s2322_s10 + $0x70] sm:$0xff] %v1551_v50 }
 0x2a7   : >> { %1554 = vst [vmem:[%s2322_s10 + $0x78] sm:$0xff] %v1553_v54  ;;  %s3465_s10 = smov %s1561_s24 }
 0x2a8 PF: > { %s3363_s9 = sand.u32 15, %s3490_s28   ;;  %s1859_s5 = sshll.u32 %s3290_s20, 7 }
 0x2a9   : > { %s1566_s1 = scalar_lea.vmem %s3172_s7, %s1859_s5 [#allocation3]   ;;  %s1568_s2 = scalar_lea.vmem %s3286_s25, %s1859_s5  }
 0x2aa   : > { %p1849_p2 = scmp.le.s32.totalorder %s3363_s9, 0 }
 0x2ab   : > { %s2336_s24 = smov (!%p1849_p2), %s1568_s2   ;;  %s2340_s11 = smov (!%p1849_p2), %s1566_s1  }
 0x2ac   : > { %1761 = sbr.rel (%p1849_p2) target bundleno = 697 (0x2b9), region = 227  ;;  %s2344_s23 = smov (!%p1849_p2), 0  }
 0x2ad   : > { %s2348_s6 = smov (!%p1849_p2), 0  }
 0x2b1 LB: >> { %v1578_v56 = vld [vmem:[%s2342_s11] sm:$0xff]  ;;  %s1580_s28 = sadd.s32 1, %s2346_s23  ;;  %s1572_s6 = sadd.s32 1, %s2350_s6   ;;  %s2350_s6 = sphi %s2348_s6, %s1572_s6   ;;  %s2346_s23 = sphi %s2344_s23, %s2345_s23   ;;  %s2342_s11 = sphi %s2340_s11, %s1585_s11   ;;  %s2338_s24 = sphi %s2336_s24, %s1586_s24  }
 0x2b2   : >> { %1579 = vst [vmem:[%s2338_s24] sm:$0xff] %v1578_v56  ;;  %p1581_p3 = scmp.ge.s32.totalorder %s1580_s28, %s3363_s9  ;;  %p1571_p4 = scmp.ge.s32.totalorder %s1572_s6, %s3363_s9 }
 0x2b4   : >> { %s3494_s28 = smov (%p1581_p3, %s1580_s28), 0  ;;  %1574 = sbr.rel (!%p1571_p4) target bundleno = 689 (0x2b1), region = 233 }
 0x2b5   : >> { %s1850_s7 = sshll.u32 %s3494_s28, 3  ;;  %s2345_s23 = smov %s3494_s28  }
 0x2b6   : >> { %s1585_s11 = scalar_lea.vmem %s1566_s1, %s1850_s7 [#allocation3]   ;;  %s1586_s24 = scalar_lea.vmem %s1568_s2, %s1850_s7  }
 0x2b9 PF: > { %s1852_s23 = sshll.u32 %s2274_s16, 2  ;;  %s1600_s5 = sshll.u32 %s3273_s21, 4  ;;  %s1601_s5 = int_to_ptr.vmem [resolvable:$true] %s1600_s5 }
 0x2ba   : > { %s1596_s25 = sadd.s32 %s2270_s15, %s1852_s23  ;;  %s2148_s16 = scalar_lea.hbm %s3420_s3, 64 }
 0x2bb   : > { %s1853_s20 = sshll.u32 %s1596_s25, 3 }
 0x2bc   : > { %s1598_s0 = scalar_lea.hbm %s3420_s3, %s1853_s20 }
 0x2bd   : > { %s1602_s29 = sshll.u32 %s1598_s0, 4  ;;  %s1603_s29 = int_to_ptr.hbm [resolvable:$true] %s1602_s29 }
 0x2be   : > { %s2142_s24 = sshra.s32 %s1603_s29, 4  ;;  %s2143_s24 = int_to_ptr.hbm [resolvable:$true] %s2142_s24 }
 0x2bf   : > { %s2144_s1 = scalar_lea.hbm %s2143_s24, 8  ;;  %p2149_p10 = scmp.lt.s32.totalorder %s2143_s24, %s3420_s3 }
 0x2c0   : > { %p2145_p5 = scmp.ne.s32.totalorder %s2143_s24, %s2144_s1  ;;  %p2150_p11 = scmp.lt.s32.totalorder %s2148_s16, %s2144_s1 }
 0x2c2   : > { %p2146_p6 = pnand %p2145_p5, %p2432_p8  ;;  %p2151_p12 = por %p2150_p11, %p2149_p10 }
 0x2c4   : > { %p2147_p7 = pneg %p2146_p6 }
 0x2c6   : > { %p2152_p13 = pnand %p2151_p12, %p2147_p7 }
 0x2c8   : > { %2155 = shalt.err (!%p2152_p13)
}
 0x2c9   : > { %s3468_s11 = scalar_lea.sflag [#allocation5], %s2590_s30 }
 0x2ca   : > { %1897 = dma.vmem_to_hbm [thread:$0]  (%p2432_p8), %s1601_s5, 128, %s1603_s29, %s3468_s11  }
 0x2cb PF: > { %p1903_p0 = scmp.ge.s32.totalorder %s2286_s19, 2  ;;  %s1621_s6 = sand.u32 1, %s2258_s12  }
 0x2cc   : > { %s1622_s28 = scalar_lea.sflag [#allocation5], %s1621_s6 }
 0x2cd   : > { %p1900_p1 = pnand %p1903_p0, %p2436_p9 }
 0x2cf   : > { %p1901_p2 = pneg %p1900_p1 }
 0x2d1   : > { %2253 = dma.done.wait (%p1901_p2), %s1622_s28, 128  }
 0x2d2   : > { %2255 = vsyncadd (%p1901_p2), %s1622_s28, 4294967168  ;;  %s17_s19 = sadd.s32 1, %s2286_s19   ;;  %s3469_s26 = sld [smem:[#allocation7_spill]] }
 0x2d3   : > { %p14_p3 = scmp.ge.s32.totalorder %s17_s19, 10   ;;  %s3470_s12 = smov %s2262_s13 }
 0x2d4   : > { %s3471_s13 = smov %s2266_s14  ;;  %s3472_s14 = smov %s2444_s4 }
 0x2d5   : > { %s3473_s15 = smov %s2278_s17  ;;  %s3474_s16 = smov %s2282_s18 }
 0x2d6   : > { %s3475_s17 = smov %s3478_s22  ;;  %16 = sbr.rel (!%p14_p3) target bundleno = 9 (0x9), region = 244 }
 0x2d8   : > { %s3476_s18 = smov %s3469_s26 }
 0x2db   :  { %1628 = vsyncpa [#allocation5], 1 }
 0x2dc   :  { %1630 = vsyncpa [#allocation5 + $0x1], 1 }

</bundles_post_ra>
